<compile_context>
chip_gen: v7x
topology: tpu7x:2x2x1
jax: 0.10.0
libtpu: 0.0.40
codegen_flags: <defaults>
</compile_context>

<pallas_src>
import functools

import jax
import jax.numpy as jnp
from jax.experimental import pallas as pl
from jax.experimental.pallas import tpu as pltpu


_SUBLANE = 8       # f32 sublane tile
_LANE = 128        # lane tile
_NEG_FILL = -1e30  # logit fill for padded classes -> softmax prob exactly 0


def _round_up(n, m):
    return (n + m - 1) // m * m


def lstm_kernel(x_ref, w_ih_ref, w_hh_ref, b_ref, w_fc_ref, b_fc_ref, out_ref,
                *, seq_len, batch, hidden):
    # Shapes (already padded / laid out by the wrapper):
    #   x_ref:    (T*Bp, F)   bf16, time-major, batch padded to sublane width
    #   w_ih_ref: (F, 4*Hp)   bf16, gate order i|f|o|g, matmul-ready
    #   w_hh_ref: (Hp, 4*Hp)  bf16, gate order i|f|o|g, matmul-ready
    #   b_ref:    (1, 4*Hp)   f32, b_ih + b_hh
    #   w_fc_ref: (Hp, Cp)    f32
    #   b_fc_ref: (1, Cp)     f32, padded classes filled with -1e30
    #   out_ref:  (Bp, Cp)    f32 softmax probabilities
    T, B, H = seq_len, batch, hidden

    # Input projection has no sequential dependence: one batched MXU push over all T steps
    # (bf16 operands, f32 accumulate), bias folded in here, outside the recurrence.
    xg = (jnp.dot(x_ref[...], w_ih_ref[...], preferred_element_type=jnp.float32)
          + b_ref[...])                                            # (T*Bp, 4Hp) f32
    # View as (T, Bp, 4Hp): each time step selects whole (8,128) vreg planes, so the slice on
    # the latency-critical serial path needs no sublane extraction.
    xg = xg.reshape(T, B, 4 * H)

    w_hh = w_hh_ref[...]                                           # (Hp, 4Hp) bf16

    h = jnp.zeros((B, H), jnp.float32)
    c = jnp.zeros((B, H), jnp.float32)

    # Fully unrolled recurrence (T is a small static Python int).
    # TODO(synk): at long sequence lengths switch to lax.fori_loop(unroll=2..4) and tile x over T
    # (pl.Buffered / emit_pipeline, >=512-row tiles) to bound vreg pressure and v7x's 64 MiB VMEM.
    for t in range(T):
        gates = xg[t] + jnp.dot(h.astype(w_hh.dtype), w_hh,
                                preferred_element_type=jnp.float32)   # (Bp, 4Hp) = i|f|o|g
        # sigmoid(z) = 0.5*tanh(0.5*z) + 0.5: keeps the activation on the EUP (tanh) slot;
        # one contiguous (Bp, 3Hp) call for i|f|o, one (Bp, Hp) tanh for g.
        ifo = 0.5 * jnp.tanh(0.5 * gates[:, :3 * H]) + 0.5
        g = jnp.tanh(gates[:, 3 * H:])
        i_g = ifo[:, :H]
        f_g = ifo[:, H:2 * H]
        o_g = ifo[:, 2 * H:3 * H]
        c = f_g * c + i_g * g
        h = o_g * jnp.tanh(c)

    # Dropout(0.2) is identity in eval mode.  Final Linear + numerically-stable softmax.
    # Exact divide: it runs once on one (Bp, Cp) tile outside the time loop, and an approx
    # reciprocal would perturb the row sums.
    logits = (jnp.dot(h, w_fc_ref[...], preferred_element_type=jnp.float32)
              + b_fc_ref[...])                                     # (Bp, Cp)
    m = jnp.max(logits, axis=-1, keepdims=True)
    e = jnp.exp(logits - m)                                        # padded classes -> exactly 0
    out_ref[...] = e / jnp.sum(e, axis=-1, keepdims=True)


def _reorder_and_pad_gates(w, H, H_pad):
    # PyTorch gate order i|f|g|o -> i|f|o|g (sigmoid gates contiguous), each gate block
    # zero-padded from H to H_pad along axis 0.
    i, f, g, o = w[:H], w[H:2 * H], w[2 * H:3 * H], w[3 * H:]
    pad_cfg = [(0, H_pad - H)] + [(0, 0)] * (w.ndim - 1)
    return jnp.concatenate([jnp.pad(blk, pad_cfg) for blk in (i, f, o, g)], axis=0)


def lstm_forward(x, w_ih, w_hh, b_ih, b_hh, w_fc, b_fc):
    """x: (B, T, F) or (B, F) -> (B, C) softmax probabilities (PyTorch LSTM.forward, eval)."""
    if x.ndim == 2:
        x = x[:, None, :]
    assert x.ndim == 3, f"Input must have 3 dimensions, got {x.shape}"
    B, T, F = x.shape
    H = w_hh.shape[1]
    C = w_fc.shape[0]

    Bp = _round_up(B, _SUBLANE)   # fill all 8 sublanes of every vreg
    Hp = _round_up(H, _LANE)      # per-gate slices become whole 128-lane blocks
    Cp = _round_up(C, _LANE)      # lane-dense output store, full-lane softmax reductions

    # ---- wrapper-side layout plumbing (runs once, outside the kernel) ----
    x_p = jnp.pad(x.astype(jnp.float32), ((0, Bp - B), (0, 0), (0, 0)))
    x_2d = jnp.transpose(x_p, (1, 0, 2)).reshape(T * Bp, F).astype(jnp.bfloat16)       # (T*Bp, F)

    w_ih_t = _reorder_and_pad_gates(w_ih.astype(jnp.float32), H, Hp).T.astype(jnp.bfloat16)  # (F,4Hp)
    w_hh_p = jnp.pad(w_hh.astype(jnp.float32), ((0, 0), (0, Hp - H)))
    w_hh_t = _reorder_and_pad_gates(w_hh_p, H, Hp).T.astype(jnp.bfloat16)                    # (Hp,4Hp)
    bias = _reorder_and_pad_gates((b_ih + b_hh).astype(jnp.float32), H, Hp).reshape(1, 4 * Hp)

    w_fc_t = jnp.pad(w_fc.astype(jnp.float32), ((0, Cp - C), (0, Hp - H))).T                 # (Hp, Cp)
    b_fc_p = jnp.concatenate(
        [b_fc.astype(jnp.float32), jnp.full((Cp - C,), _NEG_FILL, jnp.float32)]).reshape(1, Cp)

    cost = pl.CostEstimate(
        flops=2 * T * Bp * F * 4 * Hp + 2 * T * Bp * Hp * 4 * Hp + 2 * Bp * Hp * Cp,
        transcendentals=T * Bp * 5 * Hp + Bp * Cp,
        bytes_accessed=(x_2d.size * 2 + w_ih_t.size * 2 + w_hh_t.size * 2
                        + bias.size * 4 + w_fc_t.size * 4 + b_fc_p.size * 4 + Bp * Cp * 4),
    )

    vmem = pl.BlockSpec(memory_space=pltpu.MemorySpace.VMEM)
    kernel = functools.partial(lstm_kernel, seq_len=T, batch=Bp, hidden=Hp)
    # TODO(synk): at production sizes add a "parallel" grid axis over batch (uses v7x's 2nd
    # TensorCore) and tile x over T so the hoisted xg respects v7x's 64 MiB VMEM.
    out_p = pl.pallas_call(
        kernel,
        out_shape=jax.ShapeDtypeStruct((Bp, Cp), jnp.float32),
        in_specs=[vmem] * 6,
        out_specs=vmem,
        cost_estimate=cost,
    )(x_2d, w_ih_t, w_hh_t, bias, w_fc_t, b_fc_p)
    return out_p[:B, :C]


def lstm_reference(x, w_ih, w_hh, b_ih, b_hh, w_fc, b_fc):
    """Pure-JAX f32 reference matching PyTorch nn.LSTM (gate order i|f|g|o) + fc + softmax."""
    if x.ndim == 2:
        x = x[:, None, :]
    B, T, _ = x.shape
    H = w_hh.shape[1]
    h = jnp.zeros((B, H), jnp.float32)
    c = jnp.zeros((B, H), jnp.float32)
    for t in range(T):
        gates = x[:, t, :] @ w_ih.T + b_ih + h @ w_hh.T + b_hh
        i = jax.nn.sigmoid(gates[:, :H])
        f = jax.nn.sigmoid(gates[:, H:2 * H])
        g = jnp.tanh(gates[:, 2 * H:3 * H])
        o = jax.nn.sigmoid(gates[:, 3 * H:])
        c = f * c + i * g
        h = o * jnp.tanh(c)
    logits = h @ w_fc.T + b_fc
    return jax.nn.softmax(logits, axis=-1)


if __name__ == "__main__":
    # Small shapes consistent with the module's forward.
    B, T, F, H, C = 2, 8, 16, 32, 6

    key = jax.random.PRNGKey(0)
    ks = jax.random.split(key, 7)
    scale = 1.0 / jnp.sqrt(H)   # matches PyTorch's U(-1/sqrt(H), 1/sqrt(H)) init range

    x = jax.random.normal(ks[0], (B, T, F), dtype=jnp.float32)
    w_ih = jax.random.uniform(ks[1], (4 * H, F), minval=-scale, maxval=scale)
    w_hh = jax.random.uniform(ks[2], (4 * H, H), minval=-scale, maxval=scale)
    b_ih = jax.random.uniform(ks[3], (4 * H,), minval=-scale, maxval=scale)
    b_hh = jax.random.uniform(ks[4], (4 * H,), minval=-scale, maxval=scale)
    w_fc = jax.random.uniform(ks[5], (C, H), minval=-scale, maxval=scale)
    b_fc = jax.random.uniform(ks[6], (C,), minval=-scale, maxval=scale)

    out = lstm_forward(x, w_ih, w_hh, b_ih, b_hh, w_fc, b_fc)
    jax.block_until_ready(out)

    ref = lstm_reference(x, w_ih, w_hh, b_ih, b_hh, w_fc, b_fc)

    assert out.shape == (B, C)
    assert bool(jnp.all(jnp.isfinite(out)))
    # Exact divide in the softmax -> rows sum to 1 to f32 precision.
    assert bool(jnp.allclose(jnp.sum(out, axis=1), 1.0, atol=1e-5))
    # bf16 MXU operands (f32 accumulate / gate math) vs. f32 reference.
    assert bool(jnp.allclose(out, ref, atol=2e-2, rtol=2e-2))
    print("KERNEL_OK")
</pallas_src>

<mosaic_0001>
module attributes {stable_mosaic.version = 11 : i64} {
  func.func @lstm_kernel(%arg0: memref<64x16xbf16, #tpu.memory_space<vmem>>, %arg1: memref<16x512xbf16, #tpu.memory_space<vmem>>, %arg2: memref<128x512xbf16, #tpu.memory_space<vmem>>, %arg3: memref<1x512xf32, #tpu.memory_space<vmem>>, %arg4: memref<128x128xf32, #tpu.memory_space<vmem>>, %arg5: memref<1x128xf32, #tpu.memory_space<vmem>>, %arg6: memref<8x128xf32, #tpu.memory_space<vmem>>) attributes {dimension_semantics = [], scalar_prefetch = 0 : i64, scratch_operands = 0 : i64, tpu.core_type = #tpu.core_type<tc>} {
    %c0 = arith.constant 0 : index
    %c0_0 = arith.constant 0 : index
    %0 = vector.load %arg0[%c0, %c0_0] : memref<64x16xbf16, #tpu.memory_space<vmem>>, vector<64x16xbf16>
    %c0_1 = arith.constant 0 : index
    %c0_2 = arith.constant 0 : index
    %1 = vector.load %arg1[%c0_1, %c0_2] : memref<16x512xbf16, #tpu.memory_space<vmem>>, vector<16x512xbf16>
    %cst = arith.constant dense<0.000000e+00> : vector<64x512xf32>
    %2 = tpu.matmul %0, %1, %cst {dimension_numbers = #tpu.dot_dimension_numbers<[1], [0], [0], [1], [0, 0, 1, 1], [], []>} : vector<64x16xbf16>, vector<16x512xbf16>, vector<64x512xf32> -> vector<64x512xf32>
    %c0_3 = arith.constant 0 : index
    %c0_4 = arith.constant 0 : index
    %3 = vector.load %arg3[%c0_3, %c0_4] : memref<1x512xf32, #tpu.memory_space<vmem>>, vector<1x512xf32>
    %4 = vector.broadcast %3 : vector<1x512xf32> to vector<64x512xf32>
    %5 = arith.addf %2, %4 : vector<64x512xf32>
    %6 = vector.shape_cast %5 : vector<64x512xf32> to vector<8x8x512xf32>
    %c0_5 = arith.constant 0 : index
    %c0_6 = arith.constant 0 : index
    %7 = vector.load %arg2[%c0_5, %c0_6] : memref<128x512xbf16, #tpu.memory_space<vmem>>, vector<128x512xbf16>
    %cst_7 = arith.constant 0.000000e+00 : f32
    %8 = vector.broadcast %cst_7 : f32 to vector<8x128xf32>
    %cst_8 = arith.constant 0.000000e+00 : f32
    %9 = vector.broadcast %cst_8 : f32 to vector<8x128xf32>
    %10 = vector.extract_strided_slice %6 {offsets = [0, 0, 0], sizes = [1, 8, 512], strides = [1, 1, 1]} : vector<8x8x512xf32> to vector<1x8x512xf32>
    %11 = vector.shape_cast %10 : vector<1x8x512xf32> to vector<8x512xf32>
    %12 = arith.truncf %8 : vector<8x128xf32> to vector<8x128xbf16>
    %cst_9 = arith.constant dense<0.000000e+00> : vector<8x512xf32>
    %13 = tpu.matmul %12, %7, %cst_9 {dimension_numbers = #tpu.dot_dimension_numbers<[1], [0], [0], [1], [0, 0, 1, 1], [], []>} : vector<8x128xbf16>, vector<128x512xbf16>, vector<8x512xf32> -> vector<8x512xf32>
    %14 = arith.addf %11, %13 : vector<8x512xf32>
    %15 = vector.extract_strided_slice %14 {offsets = [0, 0], sizes = [8, 384], strides = [1, 1]} : vector<8x512xf32> to vector<8x384xf32>
    %cst_10 = arith.constant 5.000000e-01 : f32
    %16 = vector.broadcast %cst_10 : f32 to vector<8x384xf32>
    %17 = arith.mulf %16, %15 : vector<8x384xf32>
    %18 = math.tanh %17 : vector<8x384xf32>
    %cst_11 = arith.constant 5.000000e-01 : f32
    %19 = vector.broadcast %cst_11 : f32 to vector<8x384xf32>
    %20 = arith.mulf %19, %18 : vector<8x384xf32>
    %cst_12 = arith.constant 5.000000e-01 : f32
    %21 = vector.broadcast %cst_12 : f32 to vector<8x384xf32>
    %22 = arith.addf %20, %21 : vector<8x384xf32>
    %23 = vector.extract_strided_slice %14 {offsets = [0, 384], sizes = [8, 128], strides = [1, 1]} : vector<8x512xf32> to vector<8x128xf32>
    %24 = math.tanh %23 : vector<8x128xf32>
    %25 = vector.extract_strided_slice %22 {offsets = [0, 0], sizes = [8, 128], strides = [1, 1]} : vector<8x384xf32> to vector<8x128xf32>
    %26 = vector.extract_strided_slice %22 {offsets = [0, 128], sizes = [8, 128], strides = [1, 1]} : vector<8x384xf32> to vector<8x128xf32>
    %27 = vector.extract_strided_slice %22 {offsets = [0, 256], sizes = [8, 128], strides = [1, 1]} : vector<8x384xf32> to vector<8x128xf32>
    %28 = arith.mulf %26, %9 : vector<8x128xf32>
    %29 = arith.mulf %25, %24 : vector<8x128xf32>
    %30 = arith.addf %28, %29 : vector<8x128xf32>
    %31 = math.tanh %30 : vector<8x128xf32>
    %32 = arith.mulf %27, %31 : vector<8x128xf32>
    %33 = vector.extract_strided_slice %6 {offsets = [1, 0, 0], sizes = [1, 8, 512], strides = [1, 1, 1]} : vector<8x8x512xf32> to vector<1x8x512xf32>
    %34 = vector.shape_cast %33 : vector<1x8x512xf32> to vector<8x512xf32>
    %35 = arith.truncf %32 : vector<8x128xf32> to vector<8x128xbf16>
    %cst_13 = arith.constant dense<0.000000e+00> : vector<8x512xf32>
    %36 = tpu.matmul %35, %7, %cst_13 {dimension_numbers = #tpu.dot_dimension_numbers<[1], [0], [0], [1], [0, 0, 1, 1], [], []>} : vector<8x128xbf16>, vector<128x512xbf16>, vector<8x512xf32> -> vector<8x512xf32>
    %37 = arith.addf %34, %36 : vector<8x512xf32>
    %38 = vector.extract_strided_slice %37 {offsets = [0, 0], sizes = [8, 384], strides = [1, 1]} : vector<8x512xf32> to vector<8x384xf32>
    %cst_14 = arith.constant 5.000000e-01 : f32
    %39 = vector.broadcast %cst_14 : f32 to vector<8x384xf32>
    %40 = arith.mulf %39, %38 : vector<8x384xf32>
    %41 = math.tanh %40 : vector<8x384xf32>
    %cst_15 = arith.constant 5.000000e-01 : f32
    %42 = vector.broadcast %cst_15 : f32 to vector<8x384xf32>
    %43 = arith.mulf %42, %41 : vector<8x384xf32>
    %cst_16 = arith.constant 5.000000e-01 : f32
    %44 = vector.broadcast %cst_16 : f32 to vector<8x384xf32>
    %45 = arith.addf %43, %44 : vector<8x384xf32>
    %46 = vector.extract_strided_slice %37 {offsets = [0, 384], sizes = [8, 128], strides = [1, 1]} : vector<8x512xf32> to vector<8x128xf32>
    %47 = math.tanh %46 : vector<8x128xf32>
    %48 = vector.extract_strided_slice %45 {offsets = [0, 0], sizes = [8, 128], strides = [1, 1]} : vector<8x384xf32> to vector<8x128xf32>
    %49 = vector.extract_strided_slice %45 {offsets = [0, 128], sizes = [8, 128], strides = [1, 1]} : vector<8x384xf32> to vector<8x128xf32>
    %50 = vector.extract_strided_slice %45 {offsets = [0, 256], sizes = [8, 128], strides = [1, 1]} : vector<8x384xf32> to vector<8x128xf32>
    %51 = arith.mulf %49, %30 : vector<8x128xf32>
    %52 = arith.mulf %48, %47 : vector<8x128xf32>
    %53 = arith.addf %51, %52 : vector<8x128xf32>
    %54 = math.tanh %53 : vector<8x128xf32>
    %55 = arith.mulf %50, %54 : vector<8x128xf32>
    %56 = vector.extract_strided_slice %6 {offsets = [2, 0, 0], sizes = [1, 8, 512], strides = [1, 1, 1]} : vector<8x8x512xf32> to vector<1x8x512xf32>
    %57 = vector.shape_cast %56 : vector<1x8x512xf32> to vector<8x512xf32>
    %58 = arith.truncf %55 : vector<8x128xf32> to vector<8x128xbf16>
    %cst_17 = arith.constant dense<0.000000e+00> : vector<8x512xf32>
    %59 = tpu.matmul %58, %7, %cst_17 {dimension_numbers = #tpu.dot_dimension_numbers<[1], [0], [0], [1], [0, 0, 1, 1], [], []>} : vector<8x128xbf16>, vector<128x512xbf16>, vector<8x512xf32> -> vector<8x512xf32>
    %60 = arith.addf %57, %59 : vector<8x512xf32>
    %61 = vector.extract_strided_slice %60 {offsets = [0, 0], sizes = [8, 384], strides = [1, 1]} : vector<8x512xf32> to vector<8x384xf32>
    %cst_18 = arith.constant 5.000000e-01 : f32
    %62 = vector.broadcast %cst_18 : f32 to vector<8x384xf32>
    %63 = arith.mulf %62, %61 : vector<8x384xf32>
    %64 = math.tanh %63 : vector<8x384xf32>
    %cst_19 = arith.constant 5.000000e-01 : f32
    %65 = vector.broadcast %cst_19 : f32 to vector<8x384xf32>
    %66 = arith.mulf %65, %64 : vector<8x384xf32>
    %cst_20 = arith.constant 5.000000e-01 : f32
    %67 = vector.broadcast %cst_20 : f32 to vector<8x384xf32>
    %68 = arith.addf %66, %67 : vector<8x384xf32>
    %69 = vector.extract_strided_slice %60 {offsets = [0, 384], sizes = [8, 128], strides = [1, 1]} : vector<8x512xf32> to vector<8x128xf32>
    %70 = math.tanh %69 : vector<8x128xf32>
    %71 = vector.extract_strided_slice %68 {offsets = [0, 0], sizes = [8, 128], strides = [1, 1]} : vector<8x384xf32> to vector<8x128xf32>
    %72 = vector.extract_strided_slice %68 {offsets = [0, 128], sizes = [8, 128], strides = [1, 1]} : vector<8x384xf32> to vector<8x128xf32>
    %73 = vector.extract_strided_slice %68 {offsets = [0, 256], sizes = [8, 128], strides = [1, 1]} : vector<8x384xf32> to vector<8x128xf32>
    %74 = arith.mulf %72, %53 : vector<8x128xf32>
    %75 = arith.mulf %71, %70 : vector<8x128xf32>
    %76 = arith.addf %74, %75 : vector<8x128xf32>
    %77 = math.tanh %76 : vector<8x128xf32>
    %78 = arith.mulf %73, %77 : vector<8x128xf32>
    %79 = vector.extract_strided_slice %6 {offsets = [3, 0, 0], sizes = [1, 8, 512], strides = [1, 1, 1]} : vector<8x8x512xf32> to vector<1x8x512xf32>
    %80 = vector.shape_cast %79 : vector<1x8x512xf32> to vector<8x512xf32>
    %81 = arith.truncf %78 : vector<8x128xf32> to vector<8x128xbf16>
    %cst_21 = arith.constant dense<0.000000e+00> : vector<8x512xf32>
    %82 = tpu.matmul %81, %7, %cst_21 {dimension_numbers = #tpu.dot_dimension_numbers<[1], [0], [0], [1], [0, 0, 1, 1], [], []>} : vector<8x128xbf16>, vector<128x512xbf16>, vector<8x512xf32> -> vector<8x512xf32>
    %83 = arith.addf %80, %82 : vector<8x512xf32>
    %84 = vector.extract_strided_slice %83 {offsets = [0, 0], sizes = [8, 384], strides = [1, 1]} : vector<8x512xf32> to vector<8x384xf32>
    %cst_22 = arith.constant 5.000000e-01 : f32
    %85 = vector.broadcast %cst_22 : f32 to vector<8x384xf32>
    %86 = arith.mulf %85, %84 : vector<8x384xf32>
    %87 = math.tanh %86 : vector<8x384xf32>
    %cst_23 = arith.constant 5.000000e-01 : f32
    %88 = vector.broadcast %cst_23 : f32 to vector<8x384xf32>
    %89 = arith.mulf %88, %87 : vector<8x384xf32>
    %cst_24 = arith.constant 5.000000e-01 : f32
    %90 = vector.broadcast %cst_24 : f32 to vector<8x384xf32>
    %91 = arith.addf %89, %90 : vector<8x384xf32>
    %92 = vector.extract_strided_slice %83 {offsets = [0, 384], sizes = [8, 128], strides = [1, 1]} : vector<8x512xf32> to vector<8x128xf32>
    %93 = math.tanh %92 : vector<8x128xf32>
    %94 = vector.extract_strided_slice %91 {offsets = [0, 0], sizes = [8, 128], strides = [1, 1]} : vector<8x384xf32> to vector<8x128xf32>
    %95 = vector.extract_strided_slice %91 {offsets = [0, 128], sizes = [8, 128], strides = [1, 1]} : vector<8x384xf32> to vector<8x128xf32>
    %96 = vector.extract_strided_slice %91 {offsets = [0, 256], sizes = [8, 128], strides = [1, 1]} : vector<8x384xf32> to vector<8x128xf32>
    %97 = arith.mulf %95, %76 : vector<8x128xf32>
    %98 = arith.mulf %94, %93 : vector<8x128xf32>
    %99 = arith.addf %97, %98 : vector<8x128xf32>
    %100 = math.tanh %99 : vector<8x128xf32>
    %101 = arith.mulf %96, %100 : vector<8x128xf32>
    %102 = vector.extract_strided_slice %6 {offsets = [4, 0, 0], sizes = [1, 8, 512], strides = [1, 1, 1]} : vector<8x8x512xf32> to vector<1x8x512xf32>
    %103 = vector.shape_cast %102 : vector<1x8x512xf32> to vector<8x512xf32>
    %104 = arith.truncf %101 : vector<8x128xf32> to vector<8x128xbf16>
    %cst_25 = arith.constant dense<0.000000e+00> : vector<8x512xf32>
    %105 = tpu.matmul %104, %7, %cst_25 {dimension_numbers = #tpu.dot_dimension_numbers<[1], [0], [0], [1], [0, 0, 1, 1], [], []>} : vector<8x128xbf16>, vector<128x512xbf16>, vector<8x512xf32> -> vector<8x512xf32>
    %106 = arith.addf %103, %105 : vector<8x512xf32>
    %107 = vector.extract_strided_slice %106 {offsets = [0, 0], sizes = [8, 384], strides = [1, 1]} : vector<8x512xf32> to vector<8x384xf32>
    %cst_26 = arith.constant 5.000000e-01 : f32
    %108 = vector.broadcast %cst_26 : f32 to vector<8x384xf32>
    %109 = arith.mulf %108, %107 : vector<8x384xf32>
    %110 = math.tanh %109 : vector<8x384xf32>
    %cst_27 = arith.constant 5.000000e-01 : f32
    %111 = vector.broadcast %cst_27 : f32 to vector<8x384xf32>
    %112 = arith.mulf %111, %110 : vector<8x384xf32>
    %cst_28 = arith.constant 5.000000e-01 : f32
    %113 = vector.broadcast %cst_28 : f32 to vector<8x384xf32>
    %114 = arith.addf %112, %113 : vector<8x384xf32>
    %115 = vector.extract_strided_slice %106 {offsets = [0, 384], sizes = [8, 128], strides = [1, 1]} : vector<8x512xf32> to vector<8x128xf32>
    %116 = math.tanh %115 : vector<8x128xf32>
    %117 = vector.extract_strided_slice %114 {offsets = [0, 0], sizes = [8, 128], strides = [1, 1]} : vector<8x384xf32> to vector<8x128xf32>
    %118 = vector.extract_strided_slice %114 {offsets = [0, 128], sizes = [8, 128], strides = [1, 1]} : vector<8x384xf32> to vector<8x128xf32>
    %119 = vector.extract_strided_slice %114 {offsets = [0, 256], sizes = [8, 128], strides = [1, 1]} : vector<8x384xf32> to vector<8x128xf32>
    %120 = arith.mulf %118, %99 : vector<8x128xf32>
    %121 = arith.mulf %117, %116 : vector<8x128xf32>
    %122 = arith.addf %120, %121 : vector<8x128xf32>
    %123 = math.tanh %122 : vector<8x128xf32>
    %124 = arith.mulf %119, %123 : vector<8x128xf32>
    %125 = vector.extract_strided_slice %6 {offsets = [5, 0, 0], sizes = [1, 8, 512], strides = [1, 1, 1]} : vector<8x8x512xf32> to vector<1x8x512xf32>
    %126 = vector.shape_cast %125 : vector<1x8x512xf32> to vector<8x512xf32>
    %127 = arith.truncf %124 : vector<8x128xf32> to vector<8x128xbf16>
    %cst_29 = arith.constant dense<0.000000e+00> : vector<8x512xf32>
    %128 = tpu.matmul %127, %7, %cst_29 {dimension_numbers = #tpu.dot_dimension_numbers<[1], [0], [0], [1], [0, 0, 1, 1], [], []>} : vector<8x128xbf16>, vector<128x512xbf16>, vector<8x512xf32> -> vector<8x512xf32>
    %129 = arith.addf %126, %128 : vector<8x512xf32>
    %130 = vector.extract_strided_slice %129 {offsets = [0, 0], sizes = [8, 384], strides = [1, 1]} : vector<8x512xf32> to vector<8x384xf32>
    %cst_30 = arith.constant 5.000000e-01 : f32
    %131 = vector.broadcast %cst_30 : f32 to vector<8x384xf32>
    %132 = arith.mulf %131, %130 : vector<8x384xf32>
    %133 = math.tanh %132 : vector<8x384xf32>
    %cst_31 = arith.constant 5.000000e-01 : f32
    %134 = vector.broadcast %cst_31 : f32 to vector<8x384xf32>
    %135 = arith.mulf %134, %133 : vector<8x384xf32>
    %cst_32 = arith.constant 5.000000e-01 : f32
    %136 = vector.broadcast %cst_32 : f32 to vector<8x384xf32>
    %137 = arith.addf %135, %136 : vector<8x384xf32>
    %138 = vector.extract_strided_slice %129 {offsets = [0, 384], sizes = [8, 128], strides = [1, 1]} : vector<8x512xf32> to vector<8x128xf32>
    %139 = math.tanh %138 : vector<8x128xf32>
    %140 = vector.extract_strided_slice %137 {offsets = [0, 0], sizes = [8, 128], strides = [1, 1]} : vector<8x384xf32> to vector<8x128xf32>
    %141 = vector.extract_strided_slice %137 {offsets = [0, 128], sizes = [8, 128], strides = [1, 1]} : vector<8x384xf32> to vector<8x128xf32>
    %142 = vector.extract_strided_slice %137 {offsets = [0, 256], sizes = [8, 128], strides = [1, 1]} : vector<8x384xf32> to vector<8x128xf32>
    %143 = arith.mulf %141, %122 : vector<8x128xf32>
    %144 = arith.mulf %140, %139 : vector<8x128xf32>
    %145 = arith.addf %143, %144 : vector<8x128xf32>
    %146 = math.tanh %145 : vector<8x128xf32>
    %147 = arith.mulf %142, %146 : vector<8x128xf32>
    %148 = vector.extract_strided_slice %6 {offsets = [6, 0, 0], sizes = [1, 8, 512], strides = [1, 1, 1]} : vector<8x8x512xf32> to vector<1x8x512xf32>
    %149 = vector.shape_cast %148 : vector<1x8x512xf32> to vector<8x512xf32>
    %150 = arith.truncf %147 : vector<8x128xf32> to vector<8x128xbf16>
    %cst_33 = arith.constant dense<0.000000e+00> : vector<8x512xf32>
    %151 = tpu.matmul %150, %7, %cst_33 {dimension_numbers = #tpu.dot_dimension_numbers<[1], [0], [0], [1], [0, 0, 1, 1], [], []>} : vector<8x128xbf16>, vector<128x512xbf16>, vector<8x512xf32> -> vector<8x512xf32>
    %152 = arith.addf %149, %151 : vector<8x512xf32>
    %153 = vector.extract_strided_slice %152 {offsets = [0, 0], sizes = [8, 384], strides = [1, 1]} : vector<8x512xf32> to vector<8x384xf32>
    %cst_34 = arith.constant 5.000000e-01 : f32
    %154 = vector.broadcast %cst_34 : f32 to vector<8x384xf32>
    %155 = arith.mulf %154, %153 : vector<8x384xf32>
    %156 = math.tanh %155 : vector<8x384xf32>
    %cst_35 = arith.constant 5.000000e-01 : f32
    %157 = vector.broadcast %cst_35 : f32 to vector<8x384xf32>
    %158 = arith.mulf %157, %156 : vector<8x384xf32>
    %cst_36 = arith.constant 5.000000e-01 : f32
    %159 = vector.broadcast %cst_36 : f32 to vector<8x384xf32>
    %160 = arith.addf %158, %159 : vector<8x384xf32>
    %161 = vector.extract_strided_slice %152 {offsets = [0, 384], sizes = [8, 128], strides = [1, 1]} : vector<8x512xf32> to vector<8x128xf32>
    %162 = math.tanh %161 : vector<8x128xf32>
    %163 = vector.extract_strided_slice %160 {offsets = [0, 0], sizes = [8, 128], strides = [1, 1]} : vector<8x384xf32> to vector<8x128xf32>
    %164 = vector.extract_strided_slice %160 {offsets = [0, 128], sizes = [8, 128], strides = [1, 1]} : vector<8x384xf32> to vector<8x128xf32>
    %165 = vector.extract_strided_slice %160 {offsets = [0, 256], sizes = [8, 128], strides = [1, 1]} : vector<8x384xf32> to vector<8x128xf32>
    %166 = arith.mulf %164, %145 : vector<8x128xf32>
    %167 = arith.mulf %163, %162 : vector<8x128xf32>
    %168 = arith.addf %166, %167 : vector<8x128xf32>
    %169 = math.tanh %168 : vector<8x128xf32>
    %170 = arith.mulf %165, %169 : vector<8x128xf32>
    %171 = vector.extract_strided_slice %6 {offsets = [7, 0, 0], sizes = [1, 8, 512], strides = [1, 1, 1]} : vector<8x8x512xf32> to vector<1x8x512xf32>
    %172 = vector.shape_cast %171 : vector<1x8x512xf32> to vector<8x512xf32>
    %173 = arith.truncf %170 : vector<8x128xf32> to vector<8x128xbf16>
    %cst_37 = arith.constant dense<0.000000e+00> : vector<8x512xf32>
    %174 = tpu.matmul %173, %7, %cst_37 {dimension_numbers = #tpu.dot_dimension_numbers<[1], [0], [0], [1], [0, 0, 1, 1], [], []>} : vector<8x128xbf16>, vector<128x512xbf16>, vector<8x512xf32> -> vector<8x512xf32>
    %175 = arith.addf %172, %174 : vector<8x512xf32>
    %176 = vector.extract_strided_slice %175 {offsets = [0, 0], sizes = [8, 384], strides = [1, 1]} : vector<8x512xf32> to vector<8x384xf32>
    %cst_38 = arith.constant 5.000000e-01 : f32
    %177 = vector.broadcast %cst_38 : f32 to vector<8x384xf32>
    %178 = arith.mulf %177, %176 : vector<8x384xf32>
    %179 = math.tanh %178 : vector<8x384xf32>
    %cst_39 = arith.constant 5.000000e-01 : f32
    %180 = vector.broadcast %cst_39 : f32 to vector<8x384xf32>
    %181 = arith.mulf %180, %179 : vector<8x384xf32>
    %cst_40 = arith.constant 5.000000e-01 : f32
    %182 = vector.broadcast %cst_40 : f32 to vector<8x384xf32>
    %183 = arith.addf %181, %182 : vector<8x384xf32>
    %184 = vector.extract_strided_slice %175 {offsets = [0, 384], sizes = [8, 128], strides = [1, 1]} : vector<8x512xf32> to vector<8x128xf32>
    %185 = math.tanh %184 : vector<8x128xf32>
    %186 = vector.extract_strided_slice %183 {offsets = [0, 0], sizes = [8, 128], strides = [1, 1]} : vector<8x384xf32> to vector<8x128xf32>
    %187 = vector.extract_strided_slice %183 {offsets = [0, 128], sizes = [8, 128], strides = [1, 1]} : vector<8x384xf32> to vector<8x128xf32>
    %188 = vector.extract_strided_slice %183 {offsets = [0, 256], sizes = [8, 128], strides = [1, 1]} : vector<8x384xf32> to vector<8x128xf32>
    %189 = arith.mulf %187, %168 : vector<8x128xf32>
    %190 = arith.mulf %186, %185 : vector<8x128xf32>
    %191 = arith.addf %189, %190 : vector<8x128xf32>
    %192 = math.tanh %191 : vector<8x128xf32>
    %193 = arith.mulf %188, %192 : vector<8x128xf32>
    %c0_41 = arith.constant 0 : index
    %c0_42 = arith.constant 0 : index
    %194 = vector.load %arg4[%c0_41, %c0_42] : memref<128x128xf32, #tpu.memory_space<vmem>>, vector<128x128xf32>
    %cst_43 = arith.constant dense<0.000000e+00> : vector<8x128xf32>
    %195 = tpu.matmul %193, %194, %cst_43 {dimension_numbers = #tpu.dot_dimension_numbers<[1], [0], [0], [1], [0, 0, 1, 1], [], []>} : vector<8x128xf32>, vector<128x128xf32>, vector<8x128xf32> -> vector<8x128xf32>
    %c0_44 = arith.constant 0 : index
    %c0_45 = arith.constant 0 : index
    %196 = vector.load %arg5[%c0_44, %c0_45] : memref<1x128xf32, #tpu.memory_space<vmem>>, vector<1x128xf32>
    %197 = vector.broadcast %196 : vector<1x128xf32> to vector<8x128xf32>
    %198 = arith.addf %195, %197 : vector<8x128xf32>
    %cst_46 = arith.constant dense<0xFF800000> : vector<8xf32>
    %199 = vector.multi_reduction <maximumf>, %198, %cst_46 [1] : vector<8x128xf32> to vector<8xf32>
    %200 = vector.shape_cast %199 : vector<8xf32> to vector<8x1xf32>
    %201 = vector.broadcast %200 : vector<8x1xf32> to vector<8x128xf32>
    %202 = arith.subf %198, %201 : vector<8x128xf32>
    %203 = math.exp %202 : vector<8x128xf32>
    %cst_47 = arith.constant dense<0.000000e+00> : vector<8xf32>
    %204 = vector.multi_reduction <add>, %203, %cst_47 [1] : vector<8x128xf32> to vector<8xf32>
    %205 = vector.shape_cast %204 : vector<8xf32> to vector<8x1xf32>
    %206 = vector.broadcast %205 : vector<8x1xf32> to vector<8x128xf32>
    %207 = arith.divf %203, %206 : vector<8x128xf32>
    %c0_48 = arith.constant 0 : index
    %c0_49 = arith.constant 0 : index
    %208 = vector.load %arg6[%c0_48, %c0_49] : memref<8x128xf32, #tpu.memory_space<vmem>>, vector<8x128xf32>
    tpu.vector_store %arg6[%c0_48, %c0_49], %207 {strides = array<i32>} : memref<8x128xf32, #tpu.memory_space<vmem>>, vector<8x128xf32>,
    return
  }
}

</mosaic_0001>

<bundles_post_ra>
// kernel: tpu_custom_call.1
= control target key start
LH: loop header
LB: loop body
LE: loop exit
PB: predicated region body
PF: predicated region fallthrough
CT: control target
= control target key end

     0   :  { %11 = vsyncpa [#allocation3], 0  ;;  %s2444_s0 = inlined_call_operand.vmem [shape: bf16[64,16], index: 0, kind: input, shape index: {}]   ;;  %s2445_s1 = inlined_call_operand.vmem [shape: bf16[16,512], index: 1, kind: input, shape index: {}]   ;;  %s2446_s2 = inlined_call_operand.hbm [shape: bf16[128,512], index: 2, kind: input, shape index: {}]   ;;  %s2447_s3 = inlined_call_operand.vmem [shape: f32[1,512], index: 3, kind: input, shape index: {}]   ;;  %s2448_s4 = inlined_call_operand.hbm [shape: f32[128,128], index: 4, kind: input, shape index: {}]   ;;  %s2449_s5 = inlined_call_operand.vmem [shape: f32[1,128], index: 5, kind: input, shape index: {}]   ;;  %s2450_s6 = inlined_call_operand.hbm [shape: f32[8,128], index: 6, kind: output, shape index: {}]  }
   0x1   :  { %12 = vsyncpa [#allocation6], 0 }
   0x2   :  { %13 = vsyncpa [#allocation4], 0  ;;  %s1818_s21 = smov [#allocation2]   ;;  %s1746_s25 = scalar_lea.hbm %s2446_s2, 4096 }
   0x3   :  { %s23_s22 = sshll.u32 %s1818_s21, 4  ;;  %p1747_p0 = scmp.ne.s32.totalorder %s2446_s2, %s1746_s25  ;;  %s24_s22 = int_to_ptr.vmem [resolvable:$true] %s23_s22 }
   0x4   :  { %p1750_p1 = scmp.lt.u32.totalorder %s1746_s25, %s2446_s2 }
   0x6   :  { %p1752_p2 = pnand %p1750_p1, %p1747_p0 }
   0x8   :  { %1755 = shalt.err (!%p1752_p2)
}
   0x9   :  { %s1756_s30 = scalar_lea.vmem %s24_s22, 4096  ;;  %p1761_p4 = scmp.lt.s32.totalorder %s24_s22, %s24_s22 }
   0xa   :  { %p1757_p3 = scmp.ne.s32.totalorder %s24_s22, %s1756_s30  ;;  %p1762_p5 = scmp.lt.s32.totalorder %s1756_s30, %s1756_s30 }
   0xc   :  { %p1763_p6 = por %p1762_p5, %p1761_p4 }
   0xe   :  { %p1764_p7 = pnand %p1763_p6, %p1757_p3 }
  0x10   :  { %1767 = shalt.err (!%p1764_p7)
}
  0x11   :  { %s1819_s7 = smov 256   ;;  %s1820_s8 = smov 16  }
  0x12   :  { %29 = dma.hbm_to_vmem [thread:$0]  %s2446_s2, 4096, %s24_s22, [#allocation3], %s1819_s7, %s1819_s7, %s1820_s8  }
  0x13   :  { %s1821_s11 = smov [#allocation5]   ;;  %s1768_s15 = scalar_lea.hbm %s2448_s4, 2048 }
  0x14   :  { %s37_s12 = sshll.u32 %s1821_s11, 4  ;;  %p1769_p8 = scmp.ne.s32.totalorder %s2448_s4, %s1768_s15  ;;  %s38_s12 = int_to_ptr.vmem [resolvable:$true] %s37_s12 }
  0x15   :  { %p1772_p9 = scmp.lt.u32.totalorder %s1768_s15, %s2448_s4 }
  0x17   :  { %p1774_p10 = pnand %p1772_p9, %p1769_p8 }
  0x19   :  { %1777 = shalt.err (!%p1774_p10)
}
  0x1a   :  { %s1778_s20 = scalar_lea.vmem %s38_s12, 2048  ;;  %p1783_p12 = scmp.lt.s32.totalorder %s38_s12, %s38_s12 }
  0x1b   :  { %p1779_p11 = scmp.ne.s32.totalorder %s38_s12, %s1778_s20  ;;  %p1784_p13 = scmp.lt.s32.totalorder %s1778_s20, %s1778_s20 }
  0x1d   :  { %p1785_p0 = por %p1784_p13, %p1783_p12 }
  0x1f   :  { %p1786_p1 = pnand %p1785_p0, %p1779_p11 }
  0x21   :  { %1789 = shalt.err (!%p1786_p1)
}
  0x22   :  { %s1822_s2 = smov 128   ;;  %s1823_s21 = smov 8  }
  0x23   :  { %43 = dma.hbm_to_vmem [thread:$0]  %s2448_s4, 2048, %s38_s12, [#allocation6], %s1822_s2, %s1822_s2, %s1823_s21  }
  0x24   :  { %1812 = dma.done.wait [#allocation3], 4096  }
  0x25   :  { %1813 = vsyncadd [#allocation3], 4294963200 }
  0x26   :  { %1814 = dma.done.wait [#allocation6], 2048  }
  0x27   :  { %1815 = vsyncadd [#allocation6], 4294965248  ;;  %v2451_v0 = vmov 0   ;;  %v1572_v1 = vld [vmem:[%s2445_s1 + $0x4] ss:$16 sps:$4 sm:$0xff]   ;;  %vm127_vm0 = vcmask 130048   ;;  %v67_v41 = vlaneseq }
  0x28   :  { %172 = vmatprep.mubr.bf16.mxu0 %v2451_v0  ;;  %245 = vmatprep.mubr.bf16.mxu1 %v2451_v0  ;;  %v1574_v2 = vld [vmem:[%s2445_s1 + $0xc] ss:$16 sps:$4 sm:$0xff]   ;;  %v1576_v3 = vld [vmem:[%s2445_s1] ss:$16 sps:$4 sm:$0xff]   ;;  %v1577_v4 = vld [vmem:[%s2445_s1 + $0x8] ss:$16 sps:$4 sm:$0xff]  }
  0x29   :  { %140 = vmatprep.subr.bf16.mxu0 %v1572_v1  ;;  %213 = vmatprep.subr.bf16.mxu1 %v1574_v2  ;;  %v1578_v5 = vld [vmem:[%s2444_s0] sm:$0xff]   ;;  %v1907_v7 = vld [vmem:[#allocation2 + $0xc] ss:$16 sps:$4 sm:$0xff]   ;;  %v1912_v9 = vld [vmem:[#allocation2 + $0x8] ss:$16 sps:$4 sm:$0xff]   ;;  %v68_v42 = vshrl.u32 %v67_v41, 7 }
  0x2a   :  { %141 = vmatpush1.bf16.msra.mxu0 %v1576_v3  ;;  %214 = vmatpush1.bf16.msra.mxu1 %v1577_v4  ;;  %v1905_v6 = vld [vmem:[#allocation2 + $0x4] ss:$16 sps:$4 sm:$0xff]   ;;  %v1909_v8 = vld [vmem:[#allocation2] ss:$16 sps:$4 sm:$0xff]   ;;  %v1920_v11 = vld [vmem:[#allocation2 + $0x2c] ss:$16 sps:$4 sm:$0xff]  }
  0x2b   :  { %478 = vmatprep.subr.bf16.mxu0 %v1905_v6  ;;  %v1916_v10 = vld [vmem:[#allocation2 + $0x24] ss:$16 sps:$4 sm:$0xff]   ;;  %519 = vmatprep.subr.bf16.mxu1 %v1907_v7  ;;  %v1922_v12 = vld [vmem:[#allocation2 + $0x20] ss:$16 sps:$4 sm:$0xff]   ;;  %v1924_v13 = vld [vmem:[#allocation2 + $0x28] ss:$16 sps:$4 sm:$0xff]  }
  0x2c   :  { %v1591_v14 = vld [vmem:[%s2444_s0 + $0x8] sm:$0xff]   ;;  %v1933_v15 = vld [vmem:[#allocation2 + $0x44] ss:$16 sps:$4 sm:$0xff]   ;;  %v1939_v17 = vld [vmem:[#allocation2 + $0x40] ss:$16 sps:$4 sm:$0xff]   ;;  %v77_v43 = vsub.s32 2, %v68_v42 }
  0x2d   :  { %1444 = vmatmul.mubr.msk.bf16.vlgmr.msra.gmra.mrb[0].mxu0 %vm127_vm0, %v1578_v5  ;;  %1448 = vmatmul.mubr.msk.bf16.vlgmr.msra.gmra.mrb[0].mxu1 %vm127_vm0, %v1578_v5  ;;  %v1936_v16 = vld [vmem:[#allocation2 + $0x4c] ss:$16 sps:$4 sm:$0xff]   ;;  %v1941_v18 = vld [vmem:[#allocation2 + $0x48] ss:$16 sps:$4 sm:$0xff]   ;;  %v1945_v19 = vld [vmem:[#allocation2 + $0x64] ss:$16 sps:$4 sm:$0xff]  }
  0x2e   :  { %479 = vmatpush1.bf16.msra.mxu0 %v1909_v8  ;;  %520 = vmatpush1.bf16.msra.mxu1 %v1912_v9  ;;  %v1948_v20 = vld [vmem:[#allocation2 + $0x6c] ss:$16 sps:$4 sm:$0xff]   ;;  %v1952_v21 = vld [vmem:[#allocation2 + $0x60] ss:$16 sps:$4 sm:$0xff]   ;;  %v1955_v22 = vld [vmem:[#allocation2 + $0x68] ss:$16 sps:$4 sm:$0xff]  }
  0x2f   :  { %480 = vmatprep.subr.bf16.mxu0 %v1916_v10  ;;  %521 = vmatprep.subr.bf16.mxu1 %v1920_v11  ;;  %v1960_v23 = vld [vmem:[#allocation2 + $0x84] ss:$16 sps:$4 sm:$0xff]   ;;  %v1964_v24 = vld [vmem:[#allocation2 + $0x8c] ss:$16 sps:$4 sm:$0xff]   ;;  %v1970_v26 = vld [vmem:[#allocation2 + $0x80] ss:$16 sps:$4 sm:$0xff]  }
  0x30   :  { %182 = vmatprep.mubr.bf16.mxu0 %v2451_v0  ;;  %255 = vmatprep.mubr.bf16.mxu1 %v2451_v0  ;;  %v1604_v25 = vld [vmem:[%s2444_s0 + $0x10] sm:$0xff]   ;;  %v1974_v27 = vld [vmem:[#allocation2 + $0x88] ss:$16 sps:$4 sm:$0xff]   ;;  %v1979_v29 = vld [vmem:[#allocation2 + $0xac] ss:$16 sps:$4 sm:$0xff]   ;;  %v81_v44 = vsub.s32 3, %v68_v42 }
  0x31   :  { %v1976_v28 = vld [vmem:[#allocation2 + $0xa4] ss:$16 sps:$4 sm:$0xff]   ;;  %v1984_v30 = vld [vmem:[#allocation2 + $0xa0] ss:$16 sps:$4 sm:$0xff]   ;;  %v1986_v31 = vld [vmem:[#allocation2 + $0xa8] ss:$16 sps:$4 sm:$0xff]  }
  0x32   :  { %481 = vmatpush1.bf16.msra.mxu0 %v1922_v12  ;;  %522 = vmatpush1.bf16.msra.mxu1 %v1924_v13  ;;  %v1991_v32 = vld [vmem:[#allocation2 + $0xc4] ss:$16 sps:$4 sm:$0xff]   ;;  %v1995_v33 = vld [vmem:[#allocation2 + $0xcc] ss:$16 sps:$4 sm:$0xff]   ;;  %v2001_v35 = vld [vmem:[#allocation2 + $0xc0] ss:$16 sps:$4 sm:$0xff]  }
  0x33   :  { %482 = vmatprep.subr.bf16.mxu0 %v1933_v15  ;;  %523 = vmatprep.subr.bf16.mxu1 %v1936_v16  ;;  %v1617_v34 = vld [vmem:[%s2444_s0 + $0x18] sm:$0xff]   ;;  %v2007_v37 = vld [vmem:[#allocation2 + $0xe4] ss:$16 sps:$4 sm:$0xff]   ;;  %v2015_v39 = vld [vmem:[#allocation2 + $0xe0] ss:$16 sps:$4 sm:$0xff]   ;;  %v69_v45 = vsub.s32 0, %v68_v42 }
  0x34   :  { %v2005_v36 = vld [vmem:[#allocation2 + $0xc8] ss:$16 sps:$4 sm:$0xff]   ;;  %v2010_v38 = vld [vmem:[#allocation2 + $0xec] ss:$16 sps:$4 sm:$0xff]   ;;  %v65_v46 = vld [vmem:[%s2447_s3] sm:$0xf] }
  0x35   :  { %1445 = vmatmul.mubr.msk.bf16.gmra.mrb[4].mxu0 %vm127_vm0, %v1591_v14  ;;  %1449 = vmatmul.mubr.msk.bf16.gmra.mrb[4].mxu1 %vm127_vm0, %v1591_v14  ;;  %v2020_v40 = vld [vmem:[#allocation2 + $0xe8] ss:$16 sps:$4 sm:$0xff]   ;;  %v73_v47 = vsub.s32 1, %v68_v42  ;;  %v2067_v48 = vrot.slane %v65_v46, %v77_v43  ;;  %v2073_v51 = vrot.slane %v65_v46, %v81_v44  ;;  %v70_v52 = vrot.slane %v65_v46, %v69_v45  ;;  %s1828_s16 = smov [#allocation7]  }
  0x36   :  { %483 = vmatpush1.bf16.msra.mxu0 %v1939_v17  ;;  %192 = vmatprep.mubr.bf16.mxu0 %v2451_v0  ;;  %vm1826_vm1 = vmmov 0   ;;  %s1426_s17 = sshll.u32 %s1828_s16, 4  ;;  %s1427_s17 = int_to_ptr.vmem [resolvable:$true] %s1426_s17 }
  0x37   :  { %524 = vmatpush1.bf16.msra.mxu1 %v1941_v18  ;;  %484 = vmatprep.subr.bf16.mxu0 %v1945_v19  ;;  %v74_v55 = vrot.slane %v65_v46, %v73_v47  ;;  %s1790_s18 = scalar_lea.vmem %s1427_s17, 128  ;;  %p1795_p3 = scmp.lt.s32.totalorder %s1427_s17, %s1427_s17 }
  0x38   :  { %525 = vmatprep.subr.bf16.mxu1 %v1948_v20  ;;  %265 = vmatprep.mubr.bf16.mxu1 %v2451_v0  ;;  %p1791_p2 = scmp.ne.s32.totalorder %s1427_s17, %s1790_s18  ;;  %p1796_p4 = scmp.lt.s32.totalorder %s1790_s18, %s1790_s18 }
  0x3a   :  { %485 = vmatpush1.bf16.msra.mxu0 %v1952_v21  ;;  %p1797_p5 = por %p1796_p4, %p1795_p3 }
  0x3b   :  { %526 = vmatpush1.bf16.msra.mxu1 %v1955_v22  ;;  %486 = vmatprep.subr.bf16.mxu0 %v1960_v23 }
  0x3c   :  { %527 = vmatprep.subr.bf16.mxu1 %v1964_v24  ;;  %p1798_p6 = pnand %p1797_p5, %p1791_p2 }
  0x3d   :  { %1446 = vmatmul.mubr.msk.bf16.gmra.mrb[8].mxu0 %vm127_vm0, %v1604_v25  ;;  %1450 = vmatmul.mubr.msk.bf16.gmra.mrb[8].mxu1 %vm127_vm0, %v1604_v25 }
  0x3e   :  { %487 = vmatpush1.bf16.msra.mxu0 %v1970_v26  ;;  %202 = vmatprep.mubr.bf16.mxu0 %v2451_v0 }
  0x3f   :  { %528 = vmatpush1.bf16.msra.mxu1 %v1974_v27  ;;  %488 = vmatprep.subr.bf16.mxu0 %v1976_v28 }
  0x40   :  { %529 = vmatprep.subr.bf16.mxu1 %v1979_v29  ;;  %275 = vmatprep.mubr.bf16.mxu1 %v2451_v0 }
  0x42   :  { %489 = vmatpush1.bf16.msra.mxu0 %v1984_v30 }
  0x43   :  { %530 = vmatpush1.bf16.msra.mxu1 %v1986_v31  ;;  %490 = vmatprep.subr.bf16.mxu0 %v1991_v32 }
  0x44   :  { %531 = vmatprep.subr.bf16.mxu1 %v1995_v33 }
  0x45   :  { %1447 = vmatmul.mubr.msk.bf16.gmra.mrb[12].mxu0 %vm127_vm0, %v1617_v34  ;;  %1451 = vmatmul.mubr.msk.bf16.gmra.mrb[12].mxu1 %vm127_vm0, %v1617_v34 }
  0x46   :  { %491 = vmatpush1.bf16.msra.mxu0 %v2001_v35  ;;  %510 = vmatprep.mubr.bf16.mxu0 %v2451_v0 }
  0x47   :  { %532 = vmatpush1.bf16.msra.mxu1 %v2005_v36  ;;  %492 = vmatprep.subr.bf16.mxu0 %v2007_v37 }
  0x48   :  { %533 = vmatprep.subr.bf16.mxu1 %v2010_v38  ;;  %551 = vmatprep.mubr.bf16.mxu1 %v2451_v0 }
  0x4a   :  { %493 = vmatpush1.bf16.msra.mxu0 %v2015_v39 }
  0x4b   :  { %534 = vmatpush1.bf16.msra.mxu1 %v2020_v40  ;;  %583 = vmatprep.subr.bf16.mxu0 %v1905_v6 }
  0x4c   :  { %624 = vmatprep.subr.bf16.mxu1 %v1907_v7 }
  0x4d   :  { %511 = vmatmul.mubr.bf16.vlgmr.msra.gmra.mrb[16].mxu0 %v2451_v0 }
  0x4e   :  { %552 = vmatmul.mubr.bf16.vlgmr.msra.gmra.mrb[16].mxu1 %v2451_v0  ;;  %584 = vmatpush1.bf16.msra.mxu0 %v1909_v8 }
  0x4f   :  { %625 = vmatpush1.bf16.msra.mxu1 %v1912_v9  ;;  %585 = vmatprep.subr.bf16.mxu0 %v1916_v10 }
  0x50   :  { %626 = vmatprep.subr.bf16.mxu1 %v1920_v11  ;;  %615 = vmatprep.mubr.bf16.mxu0 %v2451_v0 }
  0x51   :  { %656 = vmatprep.mubr.bf16.mxu1 %v2451_v0 }
  0x52   :  { %586 = vmatpush1.bf16.msra.mxu0 %v1922_v12 }
  0x53   :  { %627 = vmatpush1.bf16.msra.mxu1 %v1924_v13  ;;  %587 = vmatprep.subr.bf16.mxu0 %v1933_v15 }
  0x54   :  { %628 = vmatprep.subr.bf16.mxu1 %v1936_v16 }
  0x56   :  { %588 = vmatpush1.bf16.msra.mxu0 %v1939_v17 }
  0x57   :  { %629 = vmatpush1.bf16.msra.mxu1 %v1941_v18  ;;  %589 = vmatprep.subr.bf16.mxu0 %v1945_v19 }
  0x58   :  { %630 = vmatprep.subr.bf16.mxu1 %v1948_v20 }
  0x5a   :  { %590 = vmatpush1.bf16.msra.mxu0 %v1952_v21 }
  0x5b   :  { %631 = vmatpush1.bf16.msra.mxu1 %v1955_v22  ;;  %591 = vmatprep.subr.bf16.mxu0 %v1960_v23 }
  0x5c   :  { %632 = vmatprep.subr.bf16.mxu1 %v1964_v24 }
  0x5e   :  { %592 = vmatpush1.bf16.msra.mxu0 %v1970_v26 }
  0x5f   :  { %633 = vmatpush1.bf16.msra.mxu1 %v1974_v27  ;;  %593 = vmatprep.subr.bf16.mxu0 %v1976_v28 }
  0x60   :  { %634 = vmatprep.subr.bf16.mxu1 %v1979_v29 }
  0x62   :  { %594 = vmatpush1.bf16.msra.mxu0 %v1984_v30 }
  0x63   :  { %635 = vmatpush1.bf16.msra.mxu1 %v1986_v31  ;;  %595 = vmatprep.subr.bf16.mxu0 %v1991_v32 }
  0x64   :  { %636 = vmatprep.subr.bf16.mxu1 %v1995_v33 }
  0x66   :  { %596 = vmatpush1.bf16.msra.mxu0 %v2001_v35 }
  0x67   :  { %637 = vmatpush1.bf16.msra.mxu1 %v2005_v36  ;;  %597 = vmatprep.subr.bf16.mxu0 %v2007_v37 }
  0x68   :  { %638 = vmatprep.subr.bf16.mxu1 %v2010_v38 }
  0x6a   :  { %598 = vmatpush1.bf16.msra.mxu0 %v2015_v39 }
  0x6b   :  { %639 = vmatpush1.bf16.msra.mxu1 %v2020_v40  ;;  %688 = vmatprep.subr.bf16.mxu0 %v1905_v6 }
  0x6c   :  { %729 = vmatprep.subr.bf16.mxu1 %v1907_v7 }
 0x100   :  { %v2069_v49 = vpop.f32.mrb[0].mxu0  ;;  %v2071_v50 = vpop.f32.mrb[0].mxu1 }
 0x101   :  { %v176_v53 = vpop.f32.mrb[1].mxu0  ;;  %v249_v54 = vpop.f32.mrb[1].mxu1 }
 0x102   :  { %v178_v56 = vpop.f32.mrb[2].mxu0  ;;  %v251_v57 = vpop.f32.mrb[2].mxu1 }
 0x103   :  { %v2075_v58 = vadd.f32 %v178_v56, %v70_v52  ;;  %v180_v59 = vpop.f32.mrb[3].mxu0  ;;  %v2078_v60 = vadd.f32 %v251_v57, %v2067_v48  ;;  %v253_v61 = vpop.f32.mrb[3].mxu1 }
 0x104   :  { %v2080_v62 = vadd.f32 %v180_v59, %v74_v55  ;;  %v2083_v63 = vadd.f32 %v253_v61, %v2073_v51 }
 0x108   :  { %v184_v1 = vpop.f32.mrb[4].mxu0  ;;  %v257_v2 = vpop.f32.mrb[4].mxu1 }
 0x109   :  { %v2085_v3 = vadd.f32 %v184_v1, %v70_v52  ;;  %v186_v4 = vpop.f32.mrb[5].mxu0  ;;  %v2088_v5 = vadd.f32 %v257_v2, %v2067_v48  ;;  %v259_v14 = vpop.f32.mrb[5].mxu1 }
 0x10a   :  { %v2090_v25 = vadd.f32 %v186_v4, %v74_v55  ;;  %v188_v34 = vpop.f32.mrb[6].mxu0  ;;  %v2093_v41 = vadd.f32 %v259_v14, %v2073_v51  ;;  %v261_v42 = vpop.f32.mrb[6].mxu1 }
 0x10b   :  { %v2095_v43 = vadd.f32 %v188_v34, %v70_v52  ;;  %v190_v44 = vpop.f32.mrb[7].mxu0  ;;  %v2098_v45 = vadd.f32 %v261_v42, %v2067_v48  ;;  %v263_v46 = vpop.f32.mrb[7].mxu1 }
 0x10c   :  { %2453 = vst [vmem:[#allocation11_spill] sm:$0xff] %v2093_v41  ;;  %v2100_v47 = vadd.f32 %v190_v44, %v74_v55  ;;  %v2103_v56 = vadd.f32 %v263_v46, %v2073_v51 }
 0x10d   :  { %2454 = vst [vmem:[#allocation12_spill] sm:$0xff] %v2095_v43  ;;  %2455 = vst [vmem:[#allocation13_spill] sm:$0xff] %v2098_v45 }
 0x10e   :  { %2456 = vst [vmem:[#allocation14_spill] sm:$0xff] %v2100_v47  ;;  %2457 = vst [vmem:[#allocation15_spill] sm:$0xff] %v2103_v56 }
 0x110   :  { %v194_v57 = vpop.f32.mrb[8].mxu0  ;;  %v267_v59 = vpop.f32.mrb[8].mxu1 }
 0x111   :  { %v2105_v61 = vadd.f32 %v194_v57, %v70_v52  ;;  %v196_v1 = vpop.f32.mrb[9].mxu0  ;;  %v2108_v2 = vadd.f32 %v267_v59, %v2067_v48  ;;  %v269_v4 = vpop.f32.mrb[9].mxu1 }
 0x112   :  { %v2110_v14 = vadd.f32 %v196_v1, %v74_v55  ;;  %v198_v34 = vpop.f32.mrb[10].mxu0  ;;  %v2113_v42 = vadd.f32 %v269_v4, %v2073_v51  ;;  %v271_v44 = vpop.f32.mrb[10].mxu1 }
 0x113   :  { %2458 = vst [vmem:[#allocation16_spill] sm:$0xff] %v2105_v61  ;;  %2459 = vst [vmem:[#allocation17_spill] sm:$0xff] %v2108_v2  ;;  %v2115_v0 = vadd.f32 %v198_v34, %v70_v52  ;;  %v200_v46 = vpop.f32.mrb[11].mxu0  ;;  %v2118_v56 = vadd.f32 %v271_v44, %v2067_v48  ;;  %v273_v57 = vpop.f32.mrb[11].mxu1 }
 0x114   :  { %2460 = vst [vmem:[#allocation18_spill] sm:$0xff] %v2110_v14  ;;  %2461 = vst [vmem:[#allocation19_spill] sm:$0xff] %v2113_v42  ;;  %v2120_v61 = vadd.f32 %v200_v46, %v74_v55  ;;  %v2123_v59 = vadd.f32 %v273_v57, %v2073_v51 }
 0x115   :  { %2462 = vst [vmem:[#allocation20_spill] sm:$0xff] %v2115_v0  ;;  %2463 = vst [vmem:[#allocation21_spill] sm:$0xff] %v2118_v56 }
 0x116   :  { %2464 = vst [vmem:[#allocation22_spill] sm:$0xff] %v2120_v61  ;;  %2465 = vst [vmem:[#allocation23_spill] sm:$0xff] %v2123_v59 }
 0x118   :  { %v204_v2 = vpop.f32.mrb[12].mxu0  ;;  %v277_v1 = vpop.f32.mrb[12].mxu1 }
 0x119   :  { %v2125_v14 = vadd.f32 %v204_v2, %v70_v52  ;;  %v206_v47 = vpop.f32.mrb[13].mxu0  ;;  %v2128_v4 = vadd.f32 %v277_v1, %v2067_v48  ;;  %v279_v34 = vpop.f32.mrb[13].mxu1 }
 0x11a   :  { %v2130_v0 = vadd.f32 %v206_v47, %v74_v55  ;;  %v208_v42 = vpop.f32.mrb[14].mxu0  ;;  %v2133_v44 = vadd.f32 %v279_v34, %v2073_v51  ;;  %v281_v46 = vpop.f32.mrb[14].mxu1  ;;  %v175_v47 = vadd.f32 %v2069_v49, %v70_v52  ;;  %v248_v34 = vadd.f32 %v2071_v50, %v2067_v48 }
 0x11b   :  { %2466 = vst [vmem:[#allocation24_spill] sm:$0xff] %v2125_v14  ;;  %2467 = vst [vmem:[#allocation25_spill] sm:$0xff] %v2128_v4  ;;  %v2135_v61 = vadd.f32 %v208_v42, %v70_v52  ;;  %v210_v57 = vpop.f32.mrb[15].mxu0  ;;  %v2138_v59 = vadd.f32 %v281_v46, %v2067_v48  ;;  %v283_v2 = vpop.f32.mrb[15].mxu1  ;;  %v250_v42 = vadd.f32 %v249_v54, %v2073_v51 }
 0x11c   :  { %2468 = vst [vmem:[#allocation26_spill] sm:$0xff] %v2130_v0  ;;  %2469 = vst [vmem:[#allocation27_spill] sm:$0xff] %v2133_v44  ;;  %v2140_v14 = vadd.f32 %v210_v57, %v74_v55  ;;  %v2143_v1 = vadd.f32 %v283_v2, %v2073_v51  ;;  %v177_v0 = vadd.f32 %v176_v53, %v74_v55 }
 0x11d   :  { %2470 = vst [vmem:[#allocation28_spill] sm:$0xff] %v2135_v61  ;;  %2471 = vst [vmem:[#allocation29_spill] sm:$0xff] %v2138_v59 }
 0x11e   :  { %2472 = vst [vmem:[#allocation30_spill] sm:$0xff] %v2140_v14  ;;  %2473 = vst [vmem:[#allocation31_spill] sm:$0xff] %v2143_v1 }
 0x120   :  { %v512_v44 = vpop.f32.mrb[16].mxu0 }
 0x121   :  { %v560_v61 = vadd.f32 %v512_v44, %v175_v47  ;;  %v553_v4 = vpop.f32.mrb[16].mxu1  ;;  %v514_v56 = vpop.f32.mrb[17].mxu0 }
 0x122   :  { %v562_v46 = vadd.f32 %v553_v4, %v248_v34  ;;  %v561_v59 = vadd.f32 %v514_v56, %v177_v0  ;;  %v555_v45 = vpop.f32.mrb[17].mxu1  ;;  %v516_v57 = vpop.f32.mrb[18].mxu0 }
 0x123   :  { %v564_v14 = vmul.f32 0.5, %v560_v61  ;;  %v563_v43 = vadd.f32 %v555_v45, %v250_v42  ;;  %v517_v2 = vpop.f32.mrb[19].mxu0  ;;  %v557_v1 = vpop.f32.mrb[18].mxu1 }
 0x124   :  { %v565_v41 = vmul.f32 0.5, %v561_v59  ;;  %v558_v49 = vpop.f32.mrb[19].mxu1  ;;  %v566_v48 = vmul.f32 0.5, %v562_v46  ;;  %v2474_v1 = vmov 0  }
 0x125   :  { %1630 = vtanh.f32 %v564_v14 }
 0x126   :  { %1632 = vtanh.f32 %v565_v41 }
 0x127   :  { %1634 = vtanh.f32 %v563_v43 }
 0x128   :  { %1636 = vtanh.f32 %v566_v48 }
 0x12f   :  { %v1631_v50 = vpop.eup %1630 }
 0x130   :  { %v570_v52 = vmul.f32 0.5, %v1631_v50  ;;  %v1633_v51 = vpop.eup %1632 }
 0x131   :  { %v571_v54 = vmul.f32 0.5, %v1633_v51  ;;  %v1635_v55 = vpop.eup %1634 }
 0x132   :  { %v573_v53 = vadd.f32 0.5, %v570_v52  ;;  %v1637_v45 = vpop.eup %1636 }
 0x133   :  { %v574_v0 = vadd.f32 0.5, %v571_v54  ;;  %v572_v59 = vmul.f32 0.5, %v1637_v45 }
 0x134   :  { %v578_v56 = vmul.f32 %v1635_v55, %v573_v53 }
 0x135   :  { %v577_v4 = vmul.f32 0.0, %v574_v0  ;;  %v575_v14 = vadd.f32 0.5, %v572_v59 }
 0x137   :  { %v2149_v61 = vadd.f32 %v578_v56, %v577_v4 }
 0x139   :  { %1638 = vtanh.f32 %v2149_v61 }
 0x143   :  { %v1639_v41 = vpop.eup %1638 }
 0x144   :  { %v581_v43 = vmul.f32 %v1639_v41, %v575_v14 }
 0x146   :  { %v582_v44 = vpack.c.bf16 %v581_v43, %v581_v43 }
 0x148   :  { %616 = vmatmul.mubr.bf16.vlgmr.msra.gmra.mrb[20].mxu0 %v582_v44  ;;  %657 = vmatmul.mubr.bf16.vlgmr.msra.gmra.mrb[20].mxu1 %v582_v44 }
 0x149   :  { %689 = vmatpush1.bf16.msra.mxu0 %v1909_v8  ;;  %730 = vmatpush1.bf16.msra.mxu1 %v1912_v9 }
 0x14a   :  { %690 = vmatprep.subr.bf16.mxu0 %v1916_v10  ;;  %731 = vmatprep.subr.bf16.mxu1 %v1920_v11 }
 0x14b   :  { %720 = vmatprep.mubr.bf16.mxu0 %v2474_v1  ;;  %761 = vmatprep.mubr.bf16.mxu1 %v2474_v1 }
 0x14d   :  { %691 = vmatpush1.bf16.msra.mxu0 %v1922_v12  ;;  %732 = vmatpush1.bf16.msra.mxu1 %v1924_v13 }
 0x14e   :  { %692 = vmatprep.subr.bf16.mxu0 %v1933_v15  ;;  %733 = vmatprep.subr.bf16.mxu1 %v1936_v16 }
 0x151   :  { %693 = vmatpush1.bf16.msra.mxu0 %v1939_v17  ;;  %734 = vmatpush1.bf16.msra.mxu1 %v1941_v18 }
 0x152   :  { %694 = vmatprep.subr.bf16.mxu0 %v1945_v19  ;;  %735 = vmatprep.subr.bf16.mxu1 %v1948_v20 }
 0x155   :  { %695 = vmatpush1.bf16.msra.mxu0 %v1952_v21  ;;  %736 = vmatpush1.bf16.msra.mxu1 %v1955_v22 }
 0x156   :  { %696 = vmatprep.subr.bf16.mxu0 %v1960_v23  ;;  %737 = vmatprep.subr.bf16.mxu1 %v1964_v24 }
 0x159   :  { %697 = vmatpush1.bf16.msra.mxu0 %v1970_v26  ;;  %738 = vmatpush1.bf16.msra.mxu1 %v1974_v27 }
 0x15a   :  { %698 = vmatprep.subr.bf16.mxu0 %v1976_v28  ;;  %739 = vmatprep.subr.bf16.mxu1 %v1979_v29 }
 0x15d   :  { %699 = vmatpush1.bf16.msra.mxu0 %v1984_v30  ;;  %740 = vmatpush1.bf16.msra.mxu1 %v1986_v31 }
 0x15e   :  { %700 = vmatprep.subr.bf16.mxu0 %v1991_v32  ;;  %741 = vmatprep.subr.bf16.mxu1 %v1995_v33 }
 0x161   :  { %701 = vmatpush1.bf16.msra.mxu0 %v2001_v35  ;;  %742 = vmatpush1.bf16.msra.mxu1 %v2005_v36 }
 0x162   :  { %702 = vmatprep.subr.bf16.mxu0 %v2007_v37  ;;  %743 = vmatprep.subr.bf16.mxu1 %v2010_v38 }
 0x165   :  { %703 = vmatpush1.bf16.msra.mxu0 %v2015_v39  ;;  %744 = vmatpush1.bf16.msra.mxu1 %v2020_v40 }
 0x166   :  { %793 = vmatprep.subr.bf16.mxu0 %v1905_v6  ;;  %834 = vmatprep.subr.bf16.mxu1 %v1907_v7 }
 0x21b   :  { %v617_v47 = vpop.f32.mrb[20].mxu0  ;;  %v658_v34 = vpop.f32.mrb[20].mxu1 }
 0x21c   :  { %v665_v42 = vadd.f32 %v617_v47, %v2075_v58  ;;  %v667_v46 = vadd.f32 %v658_v34, %v2078_v60  ;;  %v619_v57 = vpop.f32.mrb[21].mxu0  ;;  %v660_v2 = vpop.f32.mrb[21].mxu1 }
 0x21d   :  { %v666_v49 = vadd.f32 %v619_v57, %v2080_v62  ;;  %v668_v48 = vadd.f32 %v660_v2, %v2083_v63  ;;  %v621_v50 = vpop.f32.mrb[22].mxu0  ;;  %v662_v52 = vpop.f32.mrb[22].mxu1 }
 0x21e   :  { %v669_v51 = vmul.f32 0.5, %v665_v42  ;;  %v622_v53 = vpop.f32.mrb[23].mxu0  ;;  %v663_v54 = vpop.f32.mrb[23].mxu1  ;;  %v671_v0 = vmul.f32 0.5, %v667_v46 }
 0x21f   :  { %v670_v55 = vmul.f32 0.5, %v666_v49 }
 0x220   :  { %1640 = vtanh.f32 %v669_v51  ;;  %v2475_v51 = vld [vmem:[#allocation11_spill] sm:$0xff] }
 0x221   :  { %1642 = vtanh.f32 %v670_v55 }
 0x222   :  { %1644 = vtanh.f32 %v668_v48 }
 0x223   :  { %1646 = vtanh.f32 %v671_v0 }
 0x22a   :  { %v1641_v56 = vpop.eup %1640 }
 0x22b   :  { %v675_v58 = vmul.f32 0.5, %v1641_v56  ;;  %v1643_v4 = vpop.eup %1642 }
 0x22c   :  { %v676_v45 = vmul.f32 0.5, %v1643_v4  ;;  %v1645_v59 = vpop.eup %1644 }
 0x22d   :  { %v678_v60 = vadd.f32 0.5, %v675_v58  ;;  %v1647_v43 = vpop.eup %1646 }
 0x22e   :  { %v679_v62 = vadd.f32 0.5, %v676_v45  ;;  %v677_v44 = vmul.f32 0.5, %v1647_v43 }
 0x22f   :  { %v683_v14 = vmul.f32 %v1645_v59, %v678_v60 }
 0x230   :  { %v682_v63 = vmul.f32 %v679_v62, %v2149_v61  ;;  %v680_v47 = vadd.f32 0.5, %v677_v44 }
 0x232   :  { %v2191_v41 = vadd.f32 %v683_v14, %v682_v63 }
 0x234   :  { %1648 = vtanh.f32 %v2191_v41 }
 0x23e   :  { %v1649_v34 = vpop.eup %1648 }
 0x23f   :  { %v686_v42 = vmul.f32 %v1649_v34, %v680_v47 }
 0x241   :  { %v687_v46 = vpack.c.bf16 %v686_v42, %v686_v42 }
 0x243   :  { %721 = vmatmul.mubr.bf16.vlgmr.msra.gmra.mrb[24].mxu0 %v687_v46  ;;  %762 = vmatmul.mubr.bf16.vlgmr.msra.gmra.mrb[24].mxu1 %v687_v46 }
 0x244   :  { %794 = vmatpush1.bf16.msra.mxu0 %v1909_v8  ;;  %835 = vmatpush1.bf16.msra.mxu1 %v1912_v9 }
 0x245   :  { %795 = vmatprep.subr.bf16.mxu0 %v1916_v10  ;;  %836 = vmatprep.subr.bf16.mxu1 %v1920_v11 }
 0x246   :  { %825 = vmatprep.mubr.bf16.mxu0 %v2474_v1  ;;  %866 = vmatprep.mubr.bf16.mxu1 %v2474_v1 }
 0x248   :  { %796 = vmatpush1.bf16.msra.mxu0 %v1922_v12  ;;  %837 = vmatpush1.bf16.msra.mxu1 %v1924_v13 }
 0x249   :  { %797 = vmatprep.subr.bf16.mxu0 %v1933_v15  ;;  %838 = vmatprep.subr.bf16.mxu1 %v1936_v16 }
 0x24c   :  { %798 = vmatpush1.bf16.msra.mxu0 %v1939_v17  ;;  %839 = vmatpush1.bf16.msra.mxu1 %v1941_v18 }
 0x24d   :  { %799 = vmatprep.subr.bf16.mxu0 %v1945_v19  ;;  %840 = vmatprep.subr.bf16.mxu1 %v1948_v20 }
 0x250   :  { %800 = vmatpush1.bf16.msra.mxu0 %v1952_v21  ;;  %841 = vmatpush1.bf16.msra.mxu1 %v1955_v22 }
 0x251   :  { %801 = vmatprep.subr.bf16.mxu0 %v1960_v23  ;;  %842 = vmatprep.subr.bf16.mxu1 %v1964_v24 }
 0x254   :  { %802 = vmatpush1.bf16.msra.mxu0 %v1970_v26  ;;  %843 = vmatpush1.bf16.msra.mxu1 %v1974_v27 }
 0x255   :  { %803 = vmatprep.subr.bf16.mxu0 %v1976_v28  ;;  %844 = vmatprep.subr.bf16.mxu1 %v1979_v29 }
 0x258   :  { %804 = vmatpush1.bf16.msra.mxu0 %v1984_v30  ;;  %845 = vmatpush1.bf16.msra.mxu1 %v1986_v31 }
 0x259   :  { %805 = vmatprep.subr.bf16.mxu0 %v1991_v32  ;;  %846 = vmatprep.subr.bf16.mxu1 %v1995_v33 }
 0x25c   :  { %806 = vmatpush1.bf16.msra.mxu0 %v2001_v35  ;;  %847 = vmatpush1.bf16.msra.mxu1 %v2005_v36 }
 0x25d   :  { %807 = vmatprep.subr.bf16.mxu0 %v2007_v37  ;;  %848 = vmatprep.subr.bf16.mxu1 %v2010_v38 }
 0x260   :  { %808 = vmatpush1.bf16.msra.mxu0 %v2015_v39  ;;  %849 = vmatpush1.bf16.msra.mxu1 %v2020_v40 }
 0x261   :  { %898 = vmatprep.subr.bf16.mxu0 %v1905_v6  ;;  %939 = vmatprep.subr.bf16.mxu1 %v1907_v7 }
 0x316   :  { %v722_v61 = vpop.f32.mrb[24].mxu0  ;;  %v763_v57 = vpop.f32.mrb[24].mxu1 }
 0x317   :  { %v770_v2 = vadd.f32 %v722_v61, %v2085_v3  ;;  %v772_v49 = vadd.f32 %v763_v57, %v2088_v5  ;;  %v724_v48 = vpop.f32.mrb[25].mxu0  ;;  %v765_v50 = vpop.f32.mrb[25].mxu1 }
 0x318   :  { %v771_v52 = vadd.f32 %v724_v48, %v2090_v25  ;;  %v773_v53 = vadd.f32 %v765_v50, %v2475_v51  ;;  %v726_v54 = vpop.f32.mrb[26].mxu0  ;;  %v767_v55 = vpop.f32.mrb[26].mxu1  ;;  %v2477_v50 = vld [vmem:[#allocation13_spill] sm:$0xff] }
 0x319   :  { %v774_v0 = vmul.f32 0.5, %v770_v2  ;;  %v727_v56 = vpop.f32.mrb[27].mxu0  ;;  %v768_v58 = vpop.f32.mrb[27].mxu1  ;;  %v776_v60 = vmul.f32 0.5, %v772_v49  ;;  %v2476_v49 = vld [vmem:[#allocation12_spill] sm:$0xff]  ;;  %v2478_v54 = vld [vmem:[#allocation14_spill] sm:$0xff] }
 0x31a   :  { %v775_v4 = vmul.f32 0.5, %v771_v52 }
 0x31b   :  { %1650 = vtanh.f32 %v774_v0  ;;  %v2479_v0 = vld [vmem:[#allocation15_spill] sm:$0xff] }
 0x31c   :  { %1652 = vtanh.f32 %v775_v4 }
 0x31d   :  { %1654 = vtanh.f32 %v773_v53 }
 0x31e   :  { %1656 = vtanh.f32 %v776_v60 }
 0x325   :  { %v1651_v45 = vpop.eup %1650 }
 0x326   :  { %v780_v3 = vmul.f32 0.5, %v1651_v45  ;;  %v1653_v59 = vpop.eup %1652 }
 0x327   :  { %v781_v62 = vmul.f32 0.5, %v1653_v59  ;;  %v1655_v14 = vpop.eup %1654 }
 0x328   :  { %v783_v5 = vadd.f32 0.5, %v780_v3  ;;  %v1657_v47 = vpop.eup %1656 }
 0x329   :  { %v784_v25 = vadd.f32 0.5, %v781_v62  ;;  %v782_v34 = vmul.f32 0.5, %v1657_v47 }
 0x32a   :  { %v788_v63 = vmul.f32 %v1655_v14, %v783_v5 }
 0x32b   :  { %v787_v43 = vmul.f32 %v784_v25, %v2191_v41  ;;  %v785_v42 = vadd.f32 0.5, %v782_v34 }
 0x32d   :  { %v2233_v44 = vadd.f32 %v788_v63, %v787_v43 }
 0x32f   :  { %1658 = vtanh.f32 %v2233_v44 }
 0x339   :  { %v1659_v46 = vpop.eup %1658 }
 0x33a   :  { %v791_v61 = vmul.f32 %v1659_v46, %v785_v42 }
 0x33c   :  { %v792_v57 = vpack.c.bf16 %v791_v61, %v791_v61 }
 0x33e   :  { %826 = vmatmul.mubr.bf16.vlgmr.msra.gmra.mrb[28].mxu0 %v792_v57  ;;  %867 = vmatmul.mubr.bf16.vlgmr.msra.gmra.mrb[28].mxu1 %v792_v57 }
 0x33f   :  { %899 = vmatpush1.bf16.msra.mxu0 %v1909_v8  ;;  %940 = vmatpush1.bf16.msra.mxu1 %v1912_v9 }
 0x340   :  { %900 = vmatprep.subr.bf16.mxu0 %v1916_v10  ;;  %941 = vmatprep.subr.bf16.mxu1 %v1920_v11 }
 0x341   :  { %930 = vmatprep.mubr.bf16.mxu0 %v2474_v1  ;;  %971 = vmatprep.mubr.bf16.mxu1 %v2474_v1 }
 0x343   :  { %901 = vmatpush1.bf16.msra.mxu0 %v1922_v12  ;;  %942 = vmatpush1.bf16.msra.mxu1 %v1924_v13 }
 0x344   :  { %902 = vmatprep.subr.bf16.mxu0 %v1933_v15  ;;  %943 = vmatprep.subr.bf16.mxu1 %v1936_v16 }
 0x347   :  { %903 = vmatpush1.bf16.msra.mxu0 %v1939_v17  ;;  %944 = vmatpush1.bf16.msra.mxu1 %v1941_v18 }
 0x348   :  { %904 = vmatprep.subr.bf16.mxu0 %v1945_v19  ;;  %945 = vmatprep.subr.bf16.mxu1 %v1948_v20 }
 0x34b   :  { %905 = vmatpush1.bf16.msra.mxu0 %v1952_v21  ;;  %946 = vmatpush1.bf16.msra.mxu1 %v1955_v22 }
 0x34c   :  { %906 = vmatprep.subr.bf16.mxu0 %v1960_v23  ;;  %947 = vmatprep.subr.bf16.mxu1 %v1964_v24 }
 0x34f   :  { %907 = vmatpush1.bf16.msra.mxu0 %v1970_v26  ;;  %948 = vmatpush1.bf16.msra.mxu1 %v1974_v27 }
 0x350   :  { %908 = vmatprep.subr.bf16.mxu0 %v1976_v28  ;;  %949 = vmatprep.subr.bf16.mxu1 %v1979_v29 }
 0x353   :  { %909 = vmatpush1.bf16.msra.mxu0 %v1984_v30  ;;  %950 = vmatpush1.bf16.msra.mxu1 %v1986_v31 }
 0x354   :  { %910 = vmatprep.subr.bf16.mxu0 %v1991_v32  ;;  %951 = vmatprep.subr.bf16.mxu1 %v1995_v33 }
 0x357   :  { %911 = vmatpush1.bf16.msra.mxu0 %v2001_v35  ;;  %952 = vmatpush1.bf16.msra.mxu1 %v2005_v36 }
 0x358   :  { %912 = vmatprep.subr.bf16.mxu0 %v2007_v37  ;;  %953 = vmatprep.subr.bf16.mxu1 %v2010_v38 }
 0x35b   :  { %913 = vmatpush1.bf16.msra.mxu0 %v2015_v39  ;;  %954 = vmatpush1.bf16.msra.mxu1 %v2020_v40 }
 0x35c   :  { %1003 = vmatprep.subr.bf16.mxu0 %v1905_v6  ;;  %1044 = vmatprep.subr.bf16.mxu1 %v1907_v7 }
 0x411   :  { %v827_v41 = vpop.f32.mrb[28].mxu0  ;;  %v868_v2 = vpop.f32.mrb[28].mxu1 }
 0x412   :  { %v875_v48 = vadd.f32 %v827_v41, %v2476_v49  ;;  %v877_v52 = vadd.f32 %v868_v2, %v2477_v50  ;;  %v829_v51 = vpop.f32.mrb[29].mxu0  ;;  %v870_v53 = vpop.f32.mrb[29].mxu1 }
 0x413   :  { %v876_v55 = vadd.f32 %v829_v51, %v2478_v54  ;;  %v878_v56 = vadd.f32 %v870_v53, %v2479_v0  ;;  %v831_v58 = vpop.f32.mrb[30].mxu0  ;;  %v872_v4 = vpop.f32.mrb[30].mxu1 }
 0x414   :  { %v879_v60 = vmul.f32 0.5, %v875_v48  ;;  %v832_v45 = vpop.f32.mrb[31].mxu0  ;;  %v873_v3 = vpop.f32.mrb[31].mxu1  ;;  %v881_v7 = vmul.f32 0.5, %v877_v52 }
 0x415   :  { %v880_v6 = vmul.f32 0.5, %v876_v55 }
 0x416   :  { %1660 = vtanh.f32 %v879_v60 }
 0x417   :  { %1662 = vtanh.f32 %v880_v6 }
 0x418   :  { %1664 = vtanh.f32 %v878_v56 }
 0x419   :  { %1666 = vtanh.f32 %v881_v7 }
 0x420   :  { %v1661_v59 = vpop.eup %1660 }
 0x421   :  { %v885_v5 = vmul.f32 0.5, %v1661_v59  ;;  %v1663_v62 = vpop.eup %1662 }
 0x422   :  { %v886_v25 = vmul.f32 0.5, %v1663_v62  ;;  %v1665_v63 = vpop.eup %1664 }
 0x423   :  { %v888_v14 = vadd.f32 0.5, %v885_v5  ;;  %v1667_v46 = vpop.eup %1666 }
 0x424   :  { %v889_v43 = vadd.f32 0.5, %v886_v25  ;;  %v887_v61 = vmul.f32 0.5, %v1667_v46  ;;  %v2324_v25 = vld [vmem:[#allocation2] ss:$16 sps:$4 sm:$0xff]   ;;  %v2344_v46 = vld [vmem:[#allocation2 + $0x44] ss:$16 sps:$4 sm:$0xff]  }
 0x425   :  { %v893_v47 = vmul.f32 %v1665_v63, %v888_v14  ;;  %v2327_v63 = vld [vmem:[#allocation2 + $0x8] ss:$16 sps:$4 sm:$0xff]  }
 0x426   :  { %v892_v34 = vmul.f32 %v889_v43, %v2233_v44  ;;  %v890_v57 = vadd.f32 0.5, %v887_v61  ;;  %v2330_v43 = vld [vmem:[#allocation2 + $0x24] ss:$16 sps:$4 sm:$0xff]   ;;  %v2347_v61 = vld [vmem:[#allocation2 + $0x4c] ss:$16 sps:$4 sm:$0xff]  }
 0x428   :  { %v2275_v42 = vadd.f32 %v893_v47, %v892_v34  ;;  %v2333_v47 = vld [vmem:[#allocation2 + $0x2c] ss:$16 sps:$4 sm:$0xff]   ;;  %v2338_v34 = vld [vmem:[#allocation2 + $0x20] ss:$16 sps:$4 sm:$0xff]  }
 0x42a   :  { %1668 = vtanh.f32 %v2275_v42 }
 0x434   :  { %v1669_v41 = vpop.eup %1668 }
 0x435   :  { %v896_v2 = vmul.f32 %v1669_v41, %v890_v57  ;;  %v2350_v57 = vld [vmem:[#allocation2 + $0x40] ss:$16 sps:$4 sm:$0xff]   ;;  %v2353_v41 = vld [vmem:[#allocation2 + $0x48] ss:$16 sps:$4 sm:$0xff]  }
 0x437   :  { %v897_v49 = vpack.c.bf16 %v896_v2, %v896_v2  ;;  %v2356_v2 = vld [vmem:[#allocation2 + $0x64] ss:$16 sps:$4 sm:$0xff]  }
 0x439   :  { %931 = vmatmul.mubr.bf16.vlgmr.msra.gmra.mrb[32].mxu0 %v897_v49  ;;  %972 = vmatmul.mubr.bf16.vlgmr.msra.gmra.mrb[32].mxu1 %v897_v49  ;;  %v2359_v49 = vld [vmem:[#allocation2 + $0x6c] ss:$16 sps:$4 sm:$0xff]  }
 0x43a   :  { %1004 = vmatpush1.bf16.msra.mxu0 %v1909_v8  ;;  %1045 = vmatpush1.bf16.msra.mxu1 %v1912_v9  ;;  %v2310_v8 = vld [vmem:[#allocation2 + $0x4] ss:$16 sps:$4 sm:$0xff]   ;;  %v2313_v9 = vld [vmem:[#allocation2 + $0xc] ss:$16 sps:$4 sm:$0xff]  }
 0x43b   :  { %1005 = vmatprep.subr.bf16.mxu0 %v1916_v10  ;;  %1046 = vmatprep.subr.bf16.mxu1 %v1920_v11 }
 0x43c   :  { %1035 = vmatprep.mubr.bf16.mxu0 %v2474_v1  ;;  %1076 = vmatprep.mubr.bf16.mxu1 %v2474_v1 }
 0x43e   :  { %1006 = vmatpush1.bf16.msra.mxu0 %v1922_v12  ;;  %1047 = vmatpush1.bf16.msra.mxu1 %v1924_v13  ;;  %v2480_v12 = vld [vmem:[#allocation16_spill] sm:$0xff] }
 0x43f   :  { %1007 = vmatprep.subr.bf16.mxu0 %v1933_v15  ;;  %1048 = vmatprep.subr.bf16.mxu1 %v1936_v16  ;;  %v2481_v15 = vld [vmem:[#allocation17_spill] sm:$0xff] }
 0x442   :  { %1008 = vmatpush1.bf16.msra.mxu0 %v1939_v17  ;;  %1049 = vmatpush1.bf16.msra.mxu1 %v1941_v18 }
 0x443   :  { %1009 = vmatprep.subr.bf16.mxu0 %v1945_v19  ;;  %1050 = vmatprep.subr.bf16.mxu1 %v1948_v20  ;;  %v2482_v19 = vld [vmem:[#allocation18_spill] sm:$0xff] }
 0x446   :  { %1010 = vmatpush1.bf16.msra.mxu0 %v1952_v21  ;;  %1051 = vmatpush1.bf16.msra.mxu1 %v1955_v22  ;;  %v2483_v21 = vld [vmem:[#allocation19_spill] sm:$0xff] }
 0x447   :  { %1011 = vmatprep.subr.bf16.mxu0 %v1960_v23  ;;  %1052 = vmatprep.subr.bf16.mxu1 %v1964_v24 }
 0x44a   :  { %1012 = vmatpush1.bf16.msra.mxu0 %v1970_v26  ;;  %1053 = vmatpush1.bf16.msra.mxu1 %v1974_v27 }
 0x44b   :  { %1013 = vmatprep.subr.bf16.mxu0 %v1976_v28  ;;  %1054 = vmatprep.subr.bf16.mxu1 %v1979_v29 }
 0x44e   :  { %1014 = vmatpush1.bf16.msra.mxu0 %v1984_v30  ;;  %1055 = vmatpush1.bf16.msra.mxu1 %v1986_v31 }
 0x44f   :  { %1015 = vmatprep.subr.bf16.mxu0 %v1991_v32  ;;  %1056 = vmatprep.subr.bf16.mxu1 %v1995_v33 }
 0x452   :  { %1016 = vmatpush1.bf16.msra.mxu0 %v2001_v35  ;;  %1057 = vmatpush1.bf16.msra.mxu1 %v2005_v36 }
 0x453   :  { %1017 = vmatprep.subr.bf16.mxu0 %v2007_v37  ;;  %1058 = vmatprep.subr.bf16.mxu1 %v2010_v38 }
 0x456   :  { %1018 = vmatpush1.bf16.msra.mxu0 %v2015_v39  ;;  %1059 = vmatpush1.bf16.msra.mxu1 %v2020_v40 }
 0x457   :  { %1108 = vmatprep.subr.bf16.mxu0 %v2310_v8  ;;  %1149 = vmatprep.subr.bf16.mxu1 %v2313_v9 }
 0x50c   :  { %v932_v10 = vpop.f32.mrb[32].mxu0  ;;  %v973_v11 = vpop.f32.mrb[32].mxu1 }
 0x50d   :  { %v980_v13 = vadd.f32 %v932_v10, %v2480_v12  ;;  %v982_v16 = vadd.f32 %v973_v11, %v2481_v15  ;;  %v934_v17 = vpop.f32.mrb[33].mxu0  ;;  %v975_v18 = vpop.f32.mrb[33].mxu1  ;;  %v2362_v10 = vld [vmem:[#allocation2 + $0x60] ss:$16 sps:$4 sm:$0xff]   ;;  %v2365_v11 = vld [vmem:[#allocation2 + $0x68] ss:$16 sps:$4 sm:$0xff]  }
 0x50e   :  { %v981_v20 = vadd.f32 %v934_v17, %v2482_v19  ;;  %v983_v22 = vadd.f32 %v975_v18, %v2483_v21  ;;  %v936_v23 = vpop.f32.mrb[34].mxu0  ;;  %v977_v24 = vpop.f32.mrb[34].mxu1  ;;  %v2368_v12 = vld [vmem:[#allocation2 + $0x84] ss:$16 sps:$4 sm:$0xff]  }
 0x50f   :  { %v984_v44 = vmul.f32 0.5, %v980_v13  ;;  %v937_v48 = vpop.f32.mrb[35].mxu0  ;;  %v978_v50 = vpop.f32.mrb[35].mxu1  ;;  %v986_v51 = vmul.f32 0.5, %v982_v16  ;;  %v2371_v13 = vld [vmem:[#allocation2 + $0x8c] ss:$16 sps:$4 sm:$0xff]  }
 0x510   :  { %v985_v52 = vmul.f32 0.5, %v981_v20 }
 0x511   :  { %1670 = vtanh.f32 %v984_v44 }
 0x512   :  { %1672 = vtanh.f32 %v985_v52 }
 0x513   :  { %1674 = vtanh.f32 %v983_v22 }
 0x514   :  { %1676 = vtanh.f32 %v986_v51 }
 0x51b   :  { %v1671_v53 = vpop.eup %1670 }
 0x51c   :  { %v990_v54 = vmul.f32 0.5, %v1671_v53  ;;  %v1673_v55 = vpop.eup %1672 }
 0x51d   :  { %v991_v56 = vmul.f32 0.5, %v1673_v55  ;;  %v1675_v58 = vpop.eup %1674 }
 0x51e   :  { %v993_v0 = vadd.f32 0.5, %v990_v54  ;;  %v1677_v6 = vpop.eup %1676 }
 0x51f   :  { %v994_v4 = vadd.f32 0.5, %v991_v56  ;;  %v992_v7 = vmul.f32 0.5, %v1677_v6  ;;  %v1733_v56 = vld [vmem:[#allocation2 + $0x88] ss:$16 sps:$4 sm:$0xff]   ;;  %v1739_v6 = vld [vmem:[#allocation2 + $0xcc] ss:$16 sps:$4 sm:$0xff]  }
 0x520   :  { %v998_v60 = vmul.f32 %v1675_v58, %v993_v0  ;;  %v1734_v58 = vld [vmem:[#allocation2 + $0xa4] ss:$16 sps:$4 sm:$0xff]  }
 0x521   :  { %v997_v45 = vmul.f32 %v994_v4, %v2275_v42  ;;  %v995_v59 = vadd.f32 0.5, %v992_v7  ;;  %v2341_v42 = vld [vmem:[#allocation2 + $0x28] ss:$16 sps:$4 sm:$0xff]   ;;  %v1735_v4 = vld [vmem:[#allocation2 + $0xac] ss:$16 sps:$4 sm:$0xff]  }
 0x522   :  { %v1740_v7 = vld [vmem:[#allocation2 + $0xc0] ss:$16 sps:$4 sm:$0xff]  }
 0x523   :  { %v2321_v3 = vadd.f32 %v998_v60, %v997_v45  ;;  %v1736_v60 = vld [vmem:[#allocation2 + $0xa0] ss:$16 sps:$4 sm:$0xff]   ;;  %v1737_v45 = vld [vmem:[#allocation2 + $0xa8] ss:$16 sps:$4 sm:$0xff]  }
 0x525   :  { %1678 = vtanh.f32 %v2321_v3 }
 0x52f   :  { %v1679_v5 = vpop.eup %1678 }
 0x530   :  { %v1001_v62 = vmul.f32 %v1679_v5, %v995_v59  ;;  %v1741_v59 = vld [vmem:[#allocation2 + $0xc8] ss:$16 sps:$4 sm:$0xff]   ;;  %v1742_v5 = vld [vmem:[#allocation2 + $0xe4] ss:$16 sps:$4 sm:$0xff]  }
 0x532   :  { %v1002_v14 = vpack.c.bf16 %v1001_v62, %v1001_v62  ;;  %v1743_v62 = vld [vmem:[#allocation2 + $0xec] ss:$16 sps:$4 sm:$0xff]  }
 0x534   :  { %1036 = vmatmul.mubr.bf16.vlgmr.msra.gmra.mrb[36].mxu0 %v1002_v14  ;;  %1077 = vmatmul.mubr.bf16.vlgmr.msra.gmra.mrb[36].mxu1 %v1002_v14  ;;  %v1744_v14 = vld [vmem:[#allocation2 + $0xe0] ss:$16 sps:$4 sm:$0xff]  }
 0x535   :  { %1109 = vmatpush1.bf16.msra.mxu0 %v2324_v25  ;;  %1150 = vmatpush1.bf16.msra.mxu1 %v2327_v63 }
 0x536   :  { %1110 = vmatprep.subr.bf16.mxu0 %v2330_v43  ;;  %1151 = vmatprep.subr.bf16.mxu1 %v2333_v47 }
 0x537   :  { %1140 = vmatprep.mubr.bf16.mxu0 %v2474_v1  ;;  %1181 = vmatprep.mubr.bf16.mxu1 %v2474_v1 }
 0x539   :  { %1111 = vmatpush1.bf16.msra.mxu0 %v2338_v34  ;;  %1152 = vmatpush1.bf16.msra.mxu1 %v2341_v42 }
 0x53a   :  { %1112 = vmatprep.subr.bf16.mxu0 %v2344_v46  ;;  %1153 = vmatprep.subr.bf16.mxu1 %v2347_v61 }
 0x53d   :  { %1113 = vmatpush1.bf16.msra.mxu0 %v2350_v57  ;;  %1154 = vmatpush1.bf16.msra.mxu1 %v2353_v41 }
 0x53e   :  { %1114 = vmatprep.subr.bf16.mxu0 %v2356_v2  ;;  %1155 = vmatprep.subr.bf16.mxu1 %v2359_v49 }
 0x541   :  { %1115 = vmatpush1.bf16.msra.mxu0 %v2362_v10  ;;  %1156 = vmatpush1.bf16.msra.mxu1 %v2365_v11 }
 0x542   :  { %1116 = vmatprep.subr.bf16.mxu0 %v2368_v12  ;;  %1157 = vmatprep.subr.bf16.mxu1 %v2371_v13 }
 0x545   :  { %1117 = vmatpush1.bf16.msra.mxu0 %v1970_v26  ;;  %1158 = vmatpush1.bf16.msra.mxu1 %v1974_v27 }
 0x546   :  { %1118 = vmatprep.subr.bf16.mxu0 %v1976_v28  ;;  %1159 = vmatprep.subr.bf16.mxu1 %v1979_v29  ;;  %v2484_v28 = vld [vmem:[#allocation20_spill] sm:$0xff] }
 0x549   :  { %1119 = vmatpush1.bf16.msra.mxu0 %v1984_v30  ;;  %1160 = vmatpush1.bf16.msra.mxu1 %v1986_v31  ;;  %v2485_v30 = vld [vmem:[#allocation21_spill] sm:$0xff] }
 0x54a   :  { %1120 = vmatprep.subr.bf16.mxu0 %v1991_v32  ;;  %1161 = vmatprep.subr.bf16.mxu1 %v1995_v33 }
 0x54d   :  { %1121 = vmatpush1.bf16.msra.mxu0 %v2001_v35  ;;  %1162 = vmatpush1.bf16.msra.mxu1 %v2005_v36  ;;  %v2486_v35 = vld [vmem:[#allocation22_spill] sm:$0xff] }
 0x54e   :  { %1122 = vmatprep.subr.bf16.mxu0 %v2007_v37  ;;  %1163 = vmatprep.subr.bf16.mxu1 %v2010_v38  ;;  %v2487_v37 = vld [vmem:[#allocation23_spill] sm:$0xff] }
 0x551   :  { %1123 = vmatpush1.bf16.msra.mxu0 %v2015_v39  ;;  %1164 = vmatpush1.bf16.msra.mxu1 %v2020_v40 }
 0x552   :  { %1213 = vmatprep.subr.bf16.mxu0 %v2310_v8  ;;  %1254 = vmatprep.subr.bf16.mxu1 %v2313_v9 }
 0x607   :  { %v1037_v26 = vpop.f32.mrb[36].mxu0  ;;  %v1078_v27 = vpop.f32.mrb[36].mxu1 }
 0x608   :  { %v1085_v29 = vadd.f32 %v1037_v26, %v2484_v28  ;;  %v1087_v31 = vadd.f32 %v1078_v27, %v2485_v30  ;;  %v1039_v32 = vpop.f32.mrb[37].mxu0  ;;  %v1080_v33 = vpop.f32.mrb[37].mxu1 }
 0x609   :  { %v1086_v36 = vadd.f32 %v1039_v32, %v2486_v35  ;;  %v1088_v38 = vadd.f32 %v1080_v33, %v2487_v37  ;;  %v1041_v15 = vpop.f32.mrb[38].mxu0  ;;  %v1082_v39 = vpop.f32.mrb[38].mxu1 }
 0x60a   :  { %v1089_v16 = vmul.f32 0.5, %v1085_v29  ;;  %v1042_v40 = vpop.f32.mrb[39].mxu0  ;;  %v1083_v17 = vpop.f32.mrb[39].mxu1  ;;  %v1091_v9 = vmul.f32 0.5, %v1087_v31 }
 0x60b   :  { %v1090_v8 = vmul.f32 0.5, %v1086_v36 }
 0x60c   :  { %1680 = vtanh.f32 %v1089_v16 }
 0x60d   :  { %1682 = vtanh.f32 %v1090_v8 }
 0x60e   :  { %1684 = vtanh.f32 %v1088_v38 }
 0x60f   :  { %1686 = vtanh.f32 %v1091_v9 }
 0x616   :  { %v1681_v18 = vpop.eup %1680 }
 0x617   :  { %v1095_v19 = vmul.f32 0.5, %v1681_v18  ;;  %v1683_v20 = vpop.eup %1682 }
 0x618   :  { %v1096_v22 = vmul.f32 0.5, %v1683_v20  ;;  %v1685_v23 = vpop.eup %1684  ;;  %v1318_v20 = vld [vmem:[#allocation5 + $0x8] sm:$0xff] }
 0x619   :  { %v1098_v21 = vadd.f32 0.5, %v1095_v19  ;;  %v1687_v52 = vpop.eup %1686  ;;  %v1317_v19 = vld [vmem:[#allocation5] sm:$0xff] }
 0x61a   :  { %v1099_v24 = vadd.f32 0.5, %v1096_v22  ;;  %v1097_v51 = vmul.f32 0.5, %v1687_v52  ;;  %v1825_v22 = vmov 0.0|0.0  }
 0x61b   :  { %v1103_v44 = vmul.f32 %v1685_v23, %v1098_v21  ;;  %v1538_v21 = vpack.c.bf16 %v1318_v20, %v1317_v19  ;;  %v1319_v23 = vld [vmem:[#allocation5 + $0x10] sm:$0xff] }
 0x61c   :  { %v1102_v48 = vmul.f32 %v1099_v24, %v2321_v3  ;;  %v1100_v53 = vadd.f32 0.5, %v1097_v51  ;;  %v1738_v3 = vld [vmem:[#allocation2 + $0xc4] ss:$16 sps:$4 sm:$0xff]   ;;  %v1320_v24 = vld [vmem:[#allocation5 + $0x18] sm:$0xff] }
 0x61d   :  { %v1323_v51 = vld [vmem:[#allocation5 + $0x30] sm:$0xff] }
 0x61e   :  { %v2395_v50 = vadd.f32 %v1103_v44, %v1102_v48  ;;  %v1541_v44 = vpack.c.bf16 %v1320_v24, %v1319_v23  ;;  %v1321_v48 = vld [vmem:[#allocation5 + $0x20] sm:$0xff] }
 0x620   :  { %1688 = vtanh.f32 %v2395_v50 }
 0x62a   :  { %v1689_v54 = vpop.eup %1688 }
 0x62b   :  { %v1106_v55 = vmul.f32 %v1689_v54, %v1100_v53  ;;  %v1324_v53 = vld [vmem:[#allocation5 + $0x38] sm:$0xff] }
 0x62c   :  { %v1547_v54 = vpack.c.bf16 %v1324_v53, %v1323_v51 }
 0x62d   :  { %v1107_v0 = vpack.c.bf16 %v1106_v55, %v1106_v55  ;;  %v1325_v55 = vld [vmem:[#allocation5 + $0x40] sm:$0xff] }
 0x62f   :  { %1141 = vmatmul.mubr.bf16.vlgmr.msra.gmra.mrb[40].mxu0 %v1107_v0  ;;  %1182 = vmatmul.mubr.bf16.vlgmr.msra.gmra.mrb[40].mxu1 %v1107_v0  ;;  %v1326_v0 = vld [vmem:[#allocation5 + $0x48] sm:$0xff] }
 0x630   :  { %1214 = vmatpush1.bf16.msra.mxu0 %v2324_v25  ;;  %1255 = vmatpush1.bf16.msra.mxu1 %v2327_v63  ;;  %v1745_v25 = vld [vmem:[#allocation2 + $0xe8] ss:$16 sps:$4 sm:$0xff]  }
 0x631   :  { %1215 = vmatprep.subr.bf16.mxu0 %v2330_v43  ;;  %1256 = vmatprep.subr.bf16.mxu1 %v2333_v47  ;;  %v2488_v47 = vld [vmem:[#allocation24_spill] sm:$0xff] }
 0x632   :  { %1245 = vmatprep.mubr.bf16.mxu0 %v2474_v1  ;;  %1286 = vmatprep.mubr.bf16.mxu1 %v2474_v1  ;;  %v1732_v1 = vld [vmem:[#allocation2 + $0x80] ss:$16 sps:$4 sm:$0xff]  }
 0x634   :  { %1216 = vmatpush1.bf16.msra.mxu0 %v2338_v34  ;;  %1257 = vmatpush1.bf16.msra.mxu1 %v2341_v42  ;;  %v2489_v42 = vld [vmem:[#allocation25_spill] sm:$0xff] }
 0x635   :  { %1217 = vmatprep.subr.bf16.mxu0 %v2344_v46  ;;  %1258 = vmatprep.subr.bf16.mxu1 %v2347_v61 }
 0x638   :  { %1218 = vmatpush1.bf16.msra.mxu0 %v2350_v57  ;;  %1259 = vmatpush1.bf16.msra.mxu1 %v2353_v41  ;;  %v2490_v41 = vld [vmem:[#allocation26_spill] sm:$0xff] }
 0x639   :  { %1219 = vmatprep.subr.bf16.mxu0 %v2356_v2  ;;  %1260 = vmatprep.subr.bf16.mxu1 %v2359_v49  ;;  %v2491_v49 = vld [vmem:[#allocation27_spill] sm:$0xff] }
 0x63c   :  { %1220 = vmatpush1.bf16.msra.mxu0 %v2362_v10  ;;  %1261 = vmatpush1.bf16.msra.mxu1 %v2365_v11 }
 0x63d   :  { %1221 = vmatprep.subr.bf16.mxu0 %v2368_v12  ;;  %1262 = vmatprep.subr.bf16.mxu1 %v2371_v13 }
 0x640   :  { %1222 = vmatpush1.bf16.msra.mxu0 %v1732_v1  ;;  %1263 = vmatpush1.bf16.msra.mxu1 %v1733_v56  ;;  %v1550_v1 = vpack.c.bf16 %v1326_v0, %v1325_v55  ;;  %v1327_v56 = vld [vmem:[#allocation5 + $0x50] sm:$0xff] }
 0x641   :  { %1223 = vmatprep.subr.bf16.mxu0 %v1734_v58  ;;  %1264 = vmatprep.subr.bf16.mxu1 %v1735_v4  ;;  %v1328_v58 = vld [vmem:[#allocation5 + $0x58] sm:$0xff] }
 0x642   :  { %v1553_v4 = vpack.c.bf16 %v1328_v58, %v1327_v56 }
 0x644   :  { %1224 = vmatpush1.bf16.msra.mxu0 %v1736_v60  ;;  %1265 = vmatpush1.bf16.msra.mxu1 %v1737_v45  ;;  %v1329_v60 = vld [vmem:[#allocation5 + $0x60] sm:$0xff]  ;;  %v1330_v45 = vld [vmem:[#allocation5 + $0x68] sm:$0xff] }
 0x645   :  { %1225 = vmatprep.subr.bf16.mxu0 %v1738_v3  ;;  %1266 = vmatprep.subr.bf16.mxu1 %v1739_v6  ;;  %v1827_v3 = vmov 0.0   ;;  %v1556_v6 = vpack.c.bf16 %v1330_v45, %v1329_v60 }
 0x648   :  { %1226 = vmatpush1.bf16.msra.mxu0 %v1740_v7  ;;  %1267 = vmatpush1.bf16.msra.mxu1 %v1741_v59  ;;  %v1331_v7 = vld [vmem:[#allocation5 + $0x70] sm:$0xff]  ;;  %v1332_v59 = vld [vmem:[#allocation5 + $0x78] sm:$0xff] }
 0x649   :  { %1227 = vmatprep.subr.bf16.mxu0 %v1742_v5  ;;  %1268 = vmatprep.subr.bf16.mxu1 %v1743_v62  ;;  %v1559_v5 = vpack.c.bf16 %v1332_v59, %v1331_v7 }
 0x64c   :  { %1228 = vmatpush1.bf16.msra.mxu0 %v1744_v14  ;;  %1269 = vmatpush1.bf16.msra.mxu1 %v1745_v25  ;;  %v2492_v25 = vld [vmem:[#allocation28_spill] sm:$0xff] }
 0x64d   :  { %1537 = vmatprep.subr.bf16.mxu0 %v1825_v22 }
 0x702   :  { %v1142_v63 = vpop.f32.mrb[40].mxu0  ;;  %v1183_v43 = vpop.f32.mrb[40].mxu1 }
 0x703   :  { %v1190_v34 = vadd.f32 %v1142_v63, %v2488_v47  ;;  %v1192_v46 = vadd.f32 %v1183_v43, %v2489_v42  ;;  %v1144_v61 = vpop.f32.mrb[41].mxu0  ;;  %v1185_v57 = vpop.f32.mrb[41].mxu1  ;;  %v2493_v43 = vld [vmem:[#allocation29_spill] sm:$0xff] }
 0x704   :  { %v1191_v2 = vadd.f32 %v1144_v61, %v2490_v41  ;;  %v1193_v10 = vadd.f32 %v1185_v57, %v2491_v49  ;;  %v1146_v11 = vpop.f32.mrb[42].mxu0  ;;  %v1187_v12 = vpop.f32.mrb[42].mxu1  ;;  %v2495_v57 = vld [vmem:[#allocation31_spill] sm:$0xff] }
 0x705   :  { %v1194_v13 = vmul.f32 0.5, %v1190_v34  ;;  %v1147_v26 = vpop.f32.mrb[43].mxu0  ;;  %v1188_v27 = vpop.f32.mrb[43].mxu1  ;;  %v1196_v29 = vmul.f32 0.5, %v1192_v46  ;;  %v2494_v46 = vld [vmem:[#allocation30_spill] sm:$0xff] }
 0x706   :  { %v1195_v28 = vmul.f32 0.5, %v1191_v2 }
 0x707   :  { %1690 = vtanh.f32 %v1194_v13 }
 0x708   :  { %1692 = vtanh.f32 %v1195_v28 }
 0x709   :  { %1694 = vtanh.f32 %v1193_v10 }
 0x70a   :  { %1696 = vtanh.f32 %v1196_v29 }
 0x711   :  { %v1691_v30 = vpop.eup %1690 }
 0x712   :  { %v1200_v31 = vmul.f32 0.5, %v1691_v30  ;;  %v1693_v32 = vpop.eup %1692 }
 0x713   :  { %v1201_v35 = vmul.f32 0.5, %v1693_v32  ;;  %v1695_v36 = vpop.eup %1694 }
 0x714   :  { %v1203_v33 = vadd.f32 0.5, %v1200_v31  ;;  %v1697_v16 = vpop.eup %1696 }
 0x715   :  { %v1204_v37 = vadd.f32 0.5, %v1201_v35  ;;  %v1202_v40 = vmul.f32 0.5, %v1697_v16 }
 0x716   :  { %v1208_v38 = vmul.f32 %v1695_v36, %v1203_v33 }
 0x717   :  { %v1207_v15 = vmul.f32 %v1204_v37, %v2395_v50  ;;  %v1205_v17 = vadd.f32 0.5, %v1202_v40  ;;  %v1322_v50 = vld [vmem:[#allocation5 + $0x28] sm:$0xff] }
 0x718   :  { %v1544_v52 = vpack.c.bf16 %v1322_v50, %v1321_v48 }
 0x719   :  { %v2421_v39 = vadd.f32 %v1208_v38, %v1207_v15 }
 0x71b   :  { %1698 = vtanh.f32 %v2421_v39 }
 0x725   :  { %v1699_v8 = vpop.eup %1698 }
 0x726   :  { %v1211_v9 = vmul.f32 %v1699_v8, %v1205_v17  ;;  %v1484_v8 = vld [vmem:[%s2449_s5] ss:$0 sm:$0xff] }
 0x728   :  { %v1212_v18 = vpack.c.bf16 %v1211_v9, %v1211_v9 }
 0x72a   :  { %1246 = vmatmul.mubr.bf16.vlgmr.msra.gmra.mrb[44].mxu0 %v1212_v18  ;;  %1287 = vmatmul.mubr.bf16.vlgmr.msra.gmra.mrb[44].mxu1 %v1212_v18 }
 0x72b   :  { %1539 = vmatpush3.bf16.msra.mxu0 %v1538_v21  ;;  %1534 = vmatprep.mubr.msk.f32.mxu0 %vm1826_vm1, %v1827_v3 }
 0x72c   :  { %1540 = vmatprep.subr.bf16.mxu0 %v1825_v22 }
 0x72f   :  { %1542 = vmatpush3.bf16.msra.mxu0 %v1541_v44 }
 0x730   :  { %1543 = vmatprep.subr.bf16.mxu0 %v1825_v22 }
 0x733   :  { %1545 = vmatpush3.bf16.msra.mxu0 %v1544_v52 }
 0x734   :  { %1546 = vmatprep.subr.bf16.mxu0 %v1825_v22 }
 0x737   :  { %1548 = vmatpush3.bf16.msra.mxu0 %v1547_v54 }
 0x738   :  { %1549 = vmatprep.subr.bf16.mxu0 %v1825_v22 }
 0x73b   :  { %1551 = vmatpush3.bf16.msra.mxu0 %v1550_v1 }
 0x73c   :  { %1552 = vmatprep.subr.bf16.mxu0 %v1825_v22 }
 0x73f   :  { %1554 = vmatpush3.bf16.msra.mxu0 %v1553_v4 }
 0x740   :  { %1555 = vmatprep.subr.bf16.mxu0 %v1825_v22 }
 0x743   :  { %1557 = vmatpush3.bf16.msra.mxu0 %v1556_v6 }
 0x744   :  { %1558 = vmatprep.subr.bf16.mxu0 %v1825_v22 }
 0x747   :  { %1560 = vmatpush3.bf16.msra.mxu0 %v1559_v5 }
 0x7fd   :  { %v1247_v62 = vpop.f32.mrb[44].mxu0  ;;  %v1288_v14 = vpop.f32.mrb[44].mxu1 }
 0x7fe   :  { %v1295_v63 = vadd.f32 %v1247_v62, %v2492_v25  ;;  %v1297_v47 = vadd.f32 %v1288_v14, %v2493_v43  ;;  %v1249_v34 = vpop.f32.mrb[45].mxu0  ;;  %v1290_v42 = vpop.f32.mrb[45].mxu1 }
 0x7ff   :  { %v1296_v61 = vadd.f32 %v1249_v34, %v2494_v46  ;;  %v1298_v41 = vadd.f32 %v1290_v42, %v2495_v57  ;;  %v1251_v2 = vpop.f32.mrb[46].mxu0  ;;  %v1292_v49 = vpop.f32.mrb[46].mxu1 }
 0x800   :  { %v1299_v10 = vmul.f32 0.5, %v1295_v63  ;;  %v1252_v11 = vpop.f32.mrb[47].mxu0  ;;  %v1293_v12 = vpop.f32.mrb[47].mxu1  ;;  %v1301_v26 = vmul.f32 0.5, %v1297_v47 }
 0x801   :  { %v1300_v13 = vmul.f32 0.5, %v1296_v61 }
 0x802   :  { %1700 = vtanh.f32 %v1299_v10 }
 0x803   :  { %1702 = vtanh.f32 %v1300_v13 }
 0x804   :  { %1704 = vtanh.f32 %v1298_v41 }
 0x805   :  { %1706 = vtanh.f32 %v1301_v26 }
 0x80c   :  { %v1701_v27 = vpop.eup %1700 }
 0x80d   :  { %v1305_v28 = vmul.f32 0.5, %v1701_v27  ;;  %v1703_v29 = vpop.eup %1702 }
 0x80e   :  { %v1306_v31 = vmul.f32 0.5, %v1703_v29  ;;  %v1705_v32 = vpop.eup %1704 }
 0x80f   :  { %v1308_v30 = vadd.f32 0.5, %v1305_v28  ;;  %v1707_v38 = vpop.eup %1706 }
 0x810   :  { %v1309_v33 = vadd.f32 0.5, %v1306_v31  ;;  %v1307_v15 = vmul.f32 0.5, %v1707_v38 }
 0x811   :  { %v1313_v35 = vmul.f32 %v1705_v32, %v1308_v30 }
 0x812   :  { %v1312_v36 = vmul.f32 %v1309_v33, %v2421_v39  ;;  %v1310_v16 = vadd.f32 0.5, %v1307_v15 }
 0x814   :  { %v1314_v37 = vadd.f32 %v1313_v35, %v1312_v36 }
 0x816   :  { %1708 = vtanh.f32 %v1314_v37 }
 0x820   :  { %v1709_v40 = vpop.eup %1708 }
 0x821   :  { %v1316_v17 = vmul.f32 %v1709_v40, %v1310_v16 }
 0x823   :  { %1535 = vmatmul.mubr.f32.vlgmr.msra.gmra.mrb[48].mxu0 %v1316_v17 }
 0x8f6   :  { %v1406_v9 = vpop.f32.mrb[48].mxu0 }
 0x8f7   :  { %v1407_v18 = vadd.f32 %v1484_v8, %v1406_v9  ;;  %v1536_v19 = vpop.f32.mrb[49].mxu0 }
 0x8f9   :  { %1410 = vmax.xlane.f32.xlu0 %v1407_v18 }
 0x986   :  { %v1411_v20 = vpop.xlane.xlu0 %1410 }
 0x987   :  { %v1412_v21 = vsub.f32 %v1407_v18, %v1411_v20 }
 0x989   :  { %v1413_v22 = vmul.f32 1.442695, %v1412_v21 }
 0x98b   :  { %1710 = vpow2.f32 %v1413_v22 }
 0x995   :  { %v1711_v39 = vpop.eup %1710 }
 0x996   :  { %1415 = vadd.xlane.f32.xlu0 %v1711_v39 }
 0xa23   :  { %v1416_v23 = vpop.xlane.xlu0 %1415 }
 0xa24   :  { %1712 = vrcp.f32 %v1416_v23 }
 0xa2e   :  { %v1713_v24 = vpop.eup %1712 }
 0xa2f   :  { %v1418_v44 = vmul.f32 %v1713_v24, %v1711_v39 }
 0xa31   :  { %1419 = vst [vmem:[#allocation7] sm:$0xff] %v1418_v44 }
 0xa32   :  { %1801 = shalt.err (!%p1798_p6)
}
 0xa33   :  { %s1802_s20 = scalar_lea.hbm %s2450_s6, 128 }
 0xa34   :  { %p1803_p7 = scmp.ne.s32.totalorder %s2450_s6, %s1802_s20  ;;  %p1806_p8 = scmp.lt.u32.totalorder %s1802_s20, %s2450_s6 }
 0xa36   :  { %p1808_p9 = pnand %p1806_p8, %p1803_p7 }
 0xa38   :  { %1811 = shalt.err (!%p1808_p9)
}
 0xa39   :  { %1429 = dma.vmem_to_hbm [thread:$0]  %s1427_s17, 128, %s2450_s6, [#allocation4]  }
 0xa3a   :  { %1816 = dma.done.wait [#allocation4], 128  }
 0xa3b   :  { %1817 = vsyncadd [#allocation4], 4294967168 }
 0xa3c   :  { %1433 = vsyncpa [#allocation3], 1 }
 0xa3d   :  { %1434 = vsyncpa [#allocation6], 1 }
 0xa3e   :  { %1435 = vsyncpa [#allocation4], 1 }

</bundles_post_ra>
